<compile_context>
chip_gen: v7x
topology: tpu7x:2x2x1
jax: 0.10.0
libtpu: 0.0.40
codegen_flags: <defaults>
</compile_context>

<pallas_src>
import math

import jax
import jax.numpy as jnp
from jax import lax
from jax.experimental import pallas as pl
from jax.experimental.pallas import tpu as pltpu

# ----------------------------- config ---------------------------------------
B = 2                    # batch
S = 8                    # sequence length
T = B * S                # flattened tokens
H = 32                   # hidden size
NH = 4                   # attention heads
HD = H // NH             # head dim
FF = 64                  # FFN intermediate size
VOCAB = 100
VOCAB_PAD = 128          # word table padded to a full lane tile
N_LAYERS = 2
NUM_ORG_FEATURES = 4
N_FEATS = 5 + NUM_ORG_FEATURES        # 5 scalar features + org features
HEAD_IN = H + N_FEATS                 # pooled + features
LN_EPS = 1e-12

_VMEM = pl.BlockSpec(memory_space=pltpu.MemorySpace.VMEM)


# ----------------------------- kernel ----------------------------------------
def _layer_norm(x, g, b):
    mu = jnp.mean(x, axis=-1, keepdims=True)
    var = jnp.mean((x - mu) ** 2, axis=-1, keepdims=True)
    return (x - mu) * lax.rsqrt(var + LN_EPS) * g + b


def fused_forward_kernel(
        ids_ref, bias_ref,
        word_ref, pos_ref, embg_ref, embb_ref,
        wqkv_ref, bqkv_ref, woh_ref, bo_ref, ln1g_ref, ln1b_ref,
        wi_ref, bi_ref, wf_ref, bf_ref, ln2g_ref, ln2b_ref,
        feat_ref, w1c_ref, w1f_ref, b1_ref, w2_ref, b2_ref,
        out_ref):
    """Embeddings + N_LAYERS BERT layers + regression head, one kernel."""
    f32 = jnp.float32

    # ---- embeddings: one-hot MXU gather + (pos+type) add, then LayerNorm ----
    ids = ids_ref[...]                                               # [T, 1] i32
    onehot = (lax.broadcasted_iota(jnp.int32, (T, VOCAB_PAD), 1)
              == ids).astype(f32)                                    # [T, 128]
    x = jnp.dot(onehot, word_ref[...], preferred_element_type=f32)   # [T, H]
    x = x + pos_ref[...]                                             # pre-tiled [T, H]
    x = _layer_norm(x, embg_ref[...], embb_ref[...])                 # [T, H]

    # additive attention bias (padding + cross-batch block mask), host-built
    bias2d = bias_ref[...]                                           # [T, T]

    # ---- transformer encoder layers -----------------------------------------
    for l in range(N_LAYERS):
        # fused QKV projection (1/sqrt(HD) score scale folded into Wq/bq)
        qkv = jnp.dot(x, wqkv_ref[l], preferred_element_type=f32) + bqkv_ref[l]

        # per-head attention on 2D tiles (no stacks / 3D broadcasts)
        attn_out = None
        for h in range(NH):
            q_h = qkv[:, h * HD:(h + 1) * HD]                        # [T, HD]
            k_h = qkv[:, H + h * HD:H + (h + 1) * HD]                # [T, HD]
            v_h = qkv[:, 2 * H + h * HD:2 * H + (h + 1) * HD]        # [T, HD]
            # scores = q @ k^T  (contract last dims; no materialized transpose)
            s = lax.dot_general(q_h, k_h, (((1,), (1,)), ((), ())),
                                preferred_element_type=f32) + bias2d  # [T, T]
            m = jnp.max(s, axis=-1, keepdims=True)
            e = jnp.exp(s - m)
            p = e / jnp.sum(e, axis=-1, keepdims=True)               # exact softmax
            ctx = jnp.dot(p, v_h, preferred_element_type=f32)        # [T, HD]
            contrib = jnp.dot(ctx, woh_ref[l * NH + h],
                              preferred_element_type=f32)            # [T, H]
            attn_out = contrib if attn_out is None else attn_out + contrib
        attn_out = attn_out + bo_ref[l]
        x = _layer_norm(x + attn_out, ln1g_ref[l], ln1b_ref[l])

        # feed-forward
        # TODO(synk): HF/torch default GELU is exact erf; tanh approximation
        # keeps Mosaic lowering simple and differs by ~1e-3.
        ff = jnp.dot(x, wi_ref[l], preferred_element_type=f32) + bi_ref[l]
        ff = jax.nn.gelu(ff, approximate=True)
        ff = jnp.dot(ff, wf_ref[l], preferred_element_type=f32) + bf_ref[l]
        x = _layer_norm(x + ff, ln2g_ref[l], ln2b_ref[l])

    # ---- regression head: CLS rows + consolidated scalar features -----------
    # pooled = last_hidden_state[:, 0, :]; Dropout(0.3) -> identity (eval mode)
    # CLS selection via a constant selection matmul (sel[b, t] = (t == b*S)).
    sel = (lax.broadcasted_iota(jnp.int32, (B, T), 1)
           == lax.broadcasted_iota(jnp.int32, (B, T), 0) * S).astype(f32)
    cls = jnp.dot(sel, x, preferred_element_type=f32)                # [B, H]

    dense = (jnp.dot(cls, w1c_ref[...], preferred_element_type=f32)
             + jnp.dot(feat_ref[...], w1f_ref[...], preferred_element_type=f32)
             + b1_ref[...])                                          # [B, 64]
    dense = jnp.maximum(dense, 0.0)                                  # ReLU
    out_ref[...] = jnp.dot(dense, w2_ref[...],
                           preferred_element_type=f32) + b2_ref[...]


# --------------------------- pallas wrapper ----------------------------------
@jax.jit
def traffy_bert_regressor_forward(fp, input_ids, attention_mask,
                                  specificity, comment_length, is_priority,
                                  creation_month, day_of_week, org_features):
    ids = input_ids.astype(jnp.int32).reshape(T, 1)

    # host-side (XLA) additive attention bias: padding + cross-batch block mask
    mask_k = jnp.broadcast_to(
        attention_mask.astype(jnp.float32).reshape(1, T), (T, T))    # [T, T]
    tq = lax.broadcasted_iota(jnp.int32, (T, T), 0)
    tk = lax.broadcasted_iota(jnp.int32, (T, T), 1)
    same_batch = (tq // S) == (tk // S)
    bias = jnp.where(same_batch, (mask_k - 1.0) * 1e9, -1e9)         # [T, T]

    # consolidate all scalar features into one [B, 9] operand
    feats = jnp.concatenate(
        [specificity, comment_length, is_priority,
         creation_month, day_of_week, org_features], axis=1).astype(jnp.float32)

    args = (ids, bias,
            fp['word_emb'], fp['pos_full'], fp['emb_ln_g'], fp['emb_ln_b'],
            fp['wqkv'], fp['bqkv'], fp['wo_h'], fp['bo'],
            fp['ln1_g'], fp['ln1_b'],
            fp['wi'], fp['bi'], fp['wf'], fp['bf'],
            fp['ln2_g'], fp['ln2_b'],
            feats, fp['w1_cls'], fp['w1_feat'], fp['dense_b'],
            fp['reg_w'], fp['reg_b'])

    return pl.pallas_call(
        fused_forward_kernel,
        out_shape=jax.ShapeDtypeStruct((B, 1), jnp.float32),
        in_specs=[_VMEM] * len(args),
        out_specs=_VMEM,
    )(*args)


# --------------------------- parameter init ----------------------------------
def _linear(key, in_dim, out_dim, scale=0.05):
    kw, kb = jax.random.split(key)
    w = jax.random.normal(kw, (in_dim, out_dim), jnp.float32) * scale
    b = (jax.random.normal(kb, (out_dim,), jnp.float32) * scale).reshape(1, out_dim)
    return w, b


def init_params(key):
    keys = jax.random.split(key, 8 + N_LAYERS)
    params = {
        'word_emb': jax.random.normal(keys[0], (VOCAB, H), jnp.float32) * 0.05,
        'pos_emb':  jax.random.normal(keys[1], (S, H), jnp.float32) * 0.05,
        'type_emb': jax.random.normal(keys[2], (2, H), jnp.float32) * 0.05,
        'emb_ln_g': jnp.ones((1, H), jnp.float32),
        'emb_ln_b': jnp.zeros((1, H), jnp.float32),
        'layers': [],
    }
    for l in range(N_LAYERS):
        lk = jax.random.split(keys[3 + l], 6)
        wq, bq = _linear(lk[0], H, H)
        wk, bk = _linear(lk[1], H, H)
        wv, bv = _linear(lk[2], H, H)
        wo, bo = _linear(lk[3], H, H)
        wi, bi = _linear(lk[4], H, FF)
        wf, bf = _linear(lk[5], FF, H)
        params['layers'].append(dict(
            wq=wq, bq=bq, wk=wk, bk=bk, wv=wv, bv=bv, wo=wo, bo=bo,
            ln1_g=jnp.ones((1, H), jnp.float32), ln1_b=jnp.zeros((1, H), jnp.float32),
            wi=wi, bi=bi, wf=wf, bf=bf,
            ln2_g=jnp.ones((1, H), jnp.float32), ln2_b=jnp.zeros((1, H), jnp.float32)))
    params['dense_w'], params['dense_b'] = _linear(keys[3 + N_LAYERS], HEAD_IN, 64)
    params['reg_w'], params['reg_b'] = _linear(keys[4 + N_LAYERS], 64, 1)
    return params


def fuse_params(params):
    """One-time host-side re-layout into the stacked/fused form the kernel eats."""
    sc = 1.0 / math.sqrt(HD)
    L = params['layers']
    # word table padded to a full 128-row lane tile (one-hot gather target)
    word_pad = jnp.zeros((VOCAB_PAD, H), jnp.float32).at[:VOCAB].set(params['word_emb'])
    # position + token-type(0) table, pre-tiled to the flattened token axis
    pos_full = jnp.tile(params['pos_emb'] + params['type_emb'][0:1, :], (B, 1))
    dense_w = params['dense_w']
    return {
        'word_emb': word_pad,                          # [128, H]
        'pos_full': pos_full,                          # [T, H]
        'emb_ln_g': params['emb_ln_g'], 'emb_ln_b': params['emb_ln_b'],
        # fused QKV with the 1/sqrt(HD) score scale folded into Wq / bq
        'wqkv': jnp.stack([jnp.concatenate([lp['wq'] * sc, lp['wk'], lp['wv']], axis=1)
                           for lp in L]),              # [L, H, 3H]
        'bqkv': jnp.stack([jnp.concatenate([lp['bq'] * sc, lp['bk'], lp['bv']], axis=1)
                           for lp in L]),              # [L, 1, 3H]
        # attention output projection split per head: [L*NH, HD, H]
        'wo_h': jnp.concatenate([lp['wo'].reshape(NH, HD, H) for lp in L], axis=0),
        'bo': jnp.stack([lp['bo'] for lp in L]),       # [L, 1, H]
        'ln1_g': jnp.stack([lp['ln1_g'] for lp in L]),
        'ln1_b': jnp.stack([lp['ln1_b'] for lp in L]),
        'wi': jnp.stack([lp['wi'] for lp in L]),       # [L, H, FF]
        'bi': jnp.stack([lp['bi'] for lp in L]),       # [L, 1, FF]
        'wf': jnp.stack([lp['wf'] for lp in L]),       # [L, FF, H]
        'bf': jnp.stack([lp['bf'] for lp in L]),       # [L, 1, H]
        'ln2_g': jnp.stack([lp['ln2_g'] for lp in L]),
        'ln2_b': jnp.stack([lp['ln2_b'] for lp in L]),
        # regression head: split dense weight into CLS / feature halves
        'w1_cls': dense_w[:H, :],                      # [H, 64]
        'w1_feat': dense_w[H:, :],                     # [9, 64]
        'dense_b': params['dense_b'],                  # [1, 64]
        'reg_w': params['reg_w'], 'reg_b': params['reg_b'],
    }


# -------------------------------- main ----------------------------------------
if __name__ == "__main__":
    key = jax.random.PRNGKey(0)
    k_in, k_feat, k_param = jax.random.split(key, 3)

    params = init_params(k_param)
    fused = fuse_params(params)

    kf = jax.random.split(k_feat, 7)
    input_ids = jax.random.randint(k_in, (B, S), 0, VOCAB, dtype=jnp.int32)
    attention_mask = jnp.ones((B, S), jnp.float32)
    specificity = jax.random.normal(kf[0], (B, 1), jnp.float32)
    comment_length = jax.random.normal(kf[1], (B, 1), jnp.float32)
    is_priority = jax.random.normal(kf[2], (B, 1), jnp.float32)
    creation_month = jax.random.normal(kf[3], (B, 1), jnp.float32)
    day_of_week = jax.random.normal(kf[4], (B, 1), jnp.float32)
    org_features = jax.random.normal(kf[5], (B, NUM_ORG_FEATURES), jnp.float32)

    out = traffy_bert_regressor_forward(
        fused, input_ids, attention_mask, specificity, comment_length,
        is_priority, creation_month, day_of_week, org_features)
    out = jax.block_until_ready(out)
    assert out.shape == (B, 1) and out.dtype == jnp.float32
    print("KERNEL_OK")
</pallas_src>

<mosaic_0001>
module attributes {stable_mosaic.version = 11 : i64} {
  func.func @fused_forward_kernel(%arg0: memref<16x1xi32, #tpu.memory_space<vmem>>, %arg1: memref<16x16xf32, #tpu.memory_space<vmem>>, %arg2: memref<128x32xf32, #tpu.memory_space<vmem>>, %arg3: memref<16x32xf32, #tpu.memory_space<vmem>>, %arg4: memref<1x32xf32, #tpu.memory_space<vmem>>, %arg5: memref<1x32xf32, #tpu.memory_space<vmem>>, %arg6: memref<2x32x96xf32, #tpu.memory_space<vmem>>, %arg7: memref<2x1x96xf32, #tpu.memory_space<vmem>>, %arg8: memref<8x8x32xf32, #tpu.memory_space<vmem>>, %arg9: memref<2x1x32xf32, #tpu.memory_space<vmem>>, %arg10: memref<2x1x32xf32, #tpu.memory_space<vmem>>, %arg11: memref<2x1x32xf32, #tpu.memory_space<vmem>>, %arg12: memref<2x32x64xf32, #tpu.memory_space<vmem>>, %arg13: memref<2x1x64xf32, #tpu.memory_space<vmem>>, %arg14: memref<2x64x32xf32, #tpu.memory_space<vmem>>, %arg15: memref<2x1x32xf32, #tpu.memory_space<vmem>>, %arg16: memref<2x1x32xf32, #tpu.memory_space<vmem>>, %arg17: memref<2x1x32xf32, #tpu.memory_space<vmem>>, %arg18: memref<2x9xf32, #tpu.memory_space<vmem>>, %arg19: memref<32x64xf32, #tpu.memory_space<vmem>>, %arg20: memref<9x64xf32, #tpu.memory_space<vmem>>, %arg21: memref<1x64xf32, #tpu.memory_space<vmem>>, %arg22: memref<64x1xf32, #tpu.memory_space<vmem>>, %arg23: memref<1x1xf32, #tpu.memory_space<vmem>>, %arg24: memref<2x1xf32, #tpu.memory_space<vmem>>) attributes {dimension_semantics = [], scalar_prefetch = 0 : i64, scratch_operands = 0 : i64, tpu.core_type = #tpu.core_type<tc>} {
    %c0 = arith.constant 0 : index
    %c0_0 = arith.constant 0 : index
    %0 = vector.load %arg0[%c0, %c0_0] : memref<16x1xi32, #tpu.memory_space<vmem>>, vector<16x1xi32>
    %1 = tpu.iota {dimensions = array<i32: 1>} : vector<16x128xi32>
    %2 = vector.broadcast %0 : vector<16x1xi32> to vector<16x128xi32>
    %3 = arith.cmpi eq, %1, %2 : vector<16x128xi32>
    %4 = arith.extui %3 : vector<16x128xi1> to vector<16x128xi32>
    %5 = arith.sitofp %4 : vector<16x128xi32> to vector<16x128xf32>
    %c0_1 = arith.constant 0 : index
    %c0_2 = arith.constant 0 : index
    %6 = vector.load %arg2[%c0_1, %c0_2] : memref<128x32xf32, #tpu.memory_space<vmem>>, vector<128x32xf32>
    %cst = arith.constant dense<0.000000e+00> : vector<16x32xf32>
    %7 = tpu.matmul %5, %6, %cst {dimension_numbers = #tpu.dot_dimension_numbers<[1], [0], [0], [1], [0, 0, 1, 1], [], []>} : vector<16x128xf32>, vector<128x32xf32>, vector<16x32xf32> -> vector<16x32xf32>
    %c0_3 = arith.constant 0 : index
    %c0_4 = arith.constant 0 : index
    %8 = vector.load %arg3[%c0_3, %c0_4] : memref<16x32xf32, #tpu.memory_space<vmem>>, vector<16x32xf32>
    %9 = arith.addf %7, %8 : vector<16x32xf32>
    %c0_5 = arith.constant 0 : index
    %c0_6 = arith.constant 0 : index
    %10 = vector.load %arg4[%c0_5, %c0_6] : memref<1x32xf32, #tpu.memory_space<vmem>>, vector<1x32xf32>
    %c0_7 = arith.constant 0 : index
    %c0_8 = arith.constant 0 : index
    %11 = vector.load %arg5[%c0_7, %c0_8] : memref<1x32xf32, #tpu.memory_space<vmem>>, vector<1x32xf32>
    %cst_9 = arith.constant dense<0.000000e+00> : vector<16xf32>
    %12 = vector.multi_reduction <add>, %9, %cst_9 [1] : vector<16x32xf32> to vector<16xf32>
    %13 = vector.shape_cast %12 : vector<16xf32> to vector<16x1xf32>
    %cst_10 = arith.constant 3.200000e+01 : f32
    %14 = vector.broadcast %cst_10 : f32 to vector<16x1xf32>
    %15 = arith.divf %13, %14 : vector<16x1xf32>
    %16 = vector.broadcast %15 : vector<16x1xf32> to vector<16x32xf32>
    %17 = arith.subf %9, %16 : vector<16x32xf32>
    %18 = arith.mulf %17, %17 : vector<16x32xf32>
    %cst_11 = arith.constant dense<0.000000e+00> : vector<16xf32>
    %19 = vector.multi_reduction <add>, %18, %cst_11 [1] : vector<16x32xf32> to vector<16xf32>
    %20 = vector.shape_cast %19 : vector<16xf32> to vector<16x1xf32>
    %cst_12 = arith.constant 3.200000e+01 : f32
    %21 = vector.broadcast %cst_12 : f32 to vector<16x1xf32>
    %22 = arith.divf %20, %21 : vector<16x1xf32>
    %23 = vector.broadcast %15 : vector<16x1xf32> to vector<16x32xf32>
    %24 = arith.subf %9, %23 : vector<16x32xf32>
    %cst_13 = arith.constant 9.99999996E-13 : f32
    %25 = vector.broadcast %cst_13 : f32 to vector<16x1xf32>
    %26 = arith.addf %22, %25 : vector<16x1xf32>
    %27 = math.rsqrt %26 : vector<16x1xf32>
    %28 = vector.broadcast %27 : vector<16x1xf32> to vector<16x32xf32>
    %29 = arith.mulf %24, %28 : vector<16x32xf32>
    %30 = vector.broadcast %10 : vector<1x32xf32> to vector<16x32xf32>
    %31 = arith.mulf %29, %30 : vector<16x32xf32>
    %32 = vector.broadcast %11 : vector<1x32xf32> to vector<16x32xf32>
    %33 = arith.addf %31, %32 : vector<16x32xf32>
    %c0_14 = arith.constant 0 : index
    %c0_15 = arith.constant 0 : index
    %34 = vector.load %arg1[%c0_14, %c0_15] : memref<16x16xf32, #tpu.memory_space<vmem>>, vector<16x16xf32>
    %c0_16 = arith.constant 0 : index
    %c0_17 = arith.constant 0 : index
    %c0_18 = arith.constant 0 : index
    %35 = vector.load %arg6[%c0_16, %c0_17, %c0_18] : memref<2x32x96xf32, #tpu.memory_space<vmem>>, vector<1x32x96xf32>
    %36 = vector.shape_cast %35 : vector<1x32x96xf32> to vector<32x96xf32>
    %cst_19 = arith.constant dense<0.000000e+00> : vector<16x96xf32>
    %37 = tpu.matmul %33, %36, %cst_19 {dimension_numbers = #tpu.dot_dimension_numbers<[1], [0], [0], [1], [0, 0, 1, 1], [], []>} : vector<16x32xf32>, vector<32x96xf32>, vector<16x96xf32> -> vector<16x96xf32>
    %c0_20 = arith.constant 0 : index
    %c0_21 = arith.constant 0 : index
    %c0_22 = arith.constant 0 : index
    %38 = vector.load %arg7[%c0_20, %c0_21, %c0_22] : memref<2x1x96xf32, #tpu.memory_space<vmem>>, vector<1x1x96xf32>
    %39 = vector.shape_cast %38 : vector<1x1x96xf32> to vector<1x96xf32>
    %40 = vector.broadcast %39 : vector<1x96xf32> to vector<16x96xf32>
    %41 = arith.addf %37, %40 : vector<16x96xf32>
    %42 = vector.extract_strided_slice %41 {offsets = [0, 0], sizes = [16, 8], strides = [1, 1]} : vector<16x96xf32> to vector<16x8xf32>
    %43 = vector.extract_strided_slice %41 {offsets = [0, 32], sizes = [16, 8], strides = [1, 1]} : vector<16x96xf32> to vector<16x8xf32>
    %44 = vector.extract_strided_slice %41 {offsets = [0, 64], sizes = [16, 8], strides = [1, 1]} : vector<16x96xf32> to vector<16x8xf32>
    %cst_23 = arith.constant dense<0.000000e+00> : vector<16x16xf32>
    %45 = tpu.matmul %42, %43, %cst_23 {dimension_numbers = #tpu.dot_dimension_numbers<[1], [1], [0], [0], [0, 0, 1, 0], [], []>} : vector<16x8xf32>, vector<16x8xf32>, vector<16x16xf32> -> vector<16x16xf32>
    %46 = arith.addf %45, %34 : vector<16x16xf32>
    %cst_24 = arith.constant dense<0xFF800000> : vector<16xf32>
    %47 = vector.multi_reduction <maximumf>, %46, %cst_24 [1] : vector<16x16xf32> to vector<16xf32>
    %48 = vector.shape_cast %47 : vector<16xf32> to vector<16x1xf32>
    %49 = vector.broadcast %48 : vector<16x1xf32> to vector<16x16xf32>
    %50 = arith.subf %46, %49 : vector<16x16xf32>
    %51 = math.exp %50 : vector<16x16xf32>
    %cst_25 = arith.constant dense<0.000000e+00> : vector<16xf32>
    %52 = vector.multi_reduction <add>, %51, %cst_25 [1] : vector<16x16xf32> to vector<16xf32>
    %53 = vector.shape_cast %52 : vector<16xf32> to vector<16x1xf32>
    %54 = vector.broadcast %53 : vector<16x1xf32> to vector<16x16xf32>
    %55 = arith.divf %51, %54 : vector<16x16xf32>
    %cst_26 = arith.constant dense<0.000000e+00> : vector<16x8xf32>
    %56 = tpu.matmul %55, %44, %cst_26 {dimension_numbers = #tpu.dot_dimension_numbers<[1], [0], [0], [1], [0, 0, 1, 1], [], []>} : vector<16x16xf32>, vector<16x8xf32>, vector<16x8xf32> -> vector<16x8xf32>
    %c0_27 = arith.constant 0 : index
    %c0_28 = arith.constant 0 : index
    %c0_29 = arith.constant 0 : index
    %57 = vector.load %arg8[%c0_27, %c0_28, %c0_29] : memref<8x8x32xf32, #tpu.memory_space<vmem>>, vector<1x8x32xf32>
    %58 = vector.shape_cast %57 : vector<1x8x32xf32> to vector<8x32xf32>
    %cst_30 = arith.constant dense<0.000000e+00> : vector<16x32xf32>
    %59 = tpu.matmul %56, %58, %cst_30 {dimension_numbers = #tpu.dot_dimension_numbers<[1], [0], [0], [1], [0, 0, 1, 1], [], []>} : vector<16x8xf32>, vector<8x32xf32>, vector<16x32xf32> -> vector<16x32xf32>
    %60 = vector.extract_strided_slice %41 {offsets = [0, 8], sizes = [16, 8], strides = [1, 1]} : vector<16x96xf32> to vector<16x8xf32>
    %61 = vector.extract_strided_slice %41 {offsets = [0, 40], sizes = [16, 8], strides = [1, 1]} : vector<16x96xf32> to vector<16x8xf32>
    %62 = vector.extract_strided_slice %41 {offsets = [0, 72], sizes = [16, 8], strides = [1, 1]} : vector<16x96xf32> to vector<16x8xf32>
    %cst_31 = arith.constant dense<0.000000e+00> : vector<16x16xf32>
    %63 = tpu.matmul %60, %61, %cst_31 {dimension_numbers = #tpu.dot_dimension_numbers<[1], [1], [0], [0], [0, 0, 1, 0], [], []>} : vector<16x8xf32>, vector<16x8xf32>, vector<16x16xf32> -> vector<16x16xf32>
    %64 = arith.addf %63, %34 : vector<16x16xf32>
    %cst_32 = arith.constant dense<0xFF800000> : vector<16xf32>
    %65 = vector.multi_reduction <maximumf>, %64, %cst_32 [1] : vector<16x16xf32> to vector<16xf32>
    %66 = vector.shape_cast %65 : vector<16xf32> to vector<16x1xf32>
    %67 = vector.broadcast %66 : vector<16x1xf32> to vector<16x16xf32>
    %68 = arith.subf %64, %67 : vector<16x16xf32>
    %69 = math.exp %68 : vector<16x16xf32>
    %cst_33 = arith.constant dense<0.000000e+00> : vector<16xf32>
    %70 = vector.multi_reduction <add>, %69, %cst_33 [1] : vector<16x16xf32> to vector<16xf32>
    %71 = vector.shape_cast %70 : vector<16xf32> to vector<16x1xf32>
    %72 = vector.broadcast %71 : vector<16x1xf32> to vector<16x16xf32>
    %73 = arith.divf %69, %72 : vector<16x16xf32>
    %cst_34 = arith.constant dense<0.000000e+00> : vector<16x8xf32>
    %74 = tpu.matmul %73, %62, %cst_34 {dimension_numbers = #tpu.dot_dimension_numbers<[1], [0], [0], [1], [0, 0, 1, 1], [], []>} : vector<16x16xf32>, vector<16x8xf32>, vector<16x8xf32> -> vector<16x8xf32>
    %c1 = arith.constant 1 : index
    %c0_35 = arith.constant 0 : index
    %c0_36 = arith.constant 0 : index
    %75 = vector.load %arg8[%c1, %c0_35, %c0_36] : memref<8x8x32xf32, #tpu.memory_space<vmem>>, vector<1x8x32xf32>
    %76 = vector.shape_cast %75 : vector<1x8x32xf32> to vector<8x32xf32>
    %cst_37 = arith.constant dense<0.000000e+00> : vector<16x32xf32>
    %77 = tpu.matmul %74, %76, %cst_37 {dimension_numbers = #tpu.dot_dimension_numbers<[1], [0], [0], [1], [0, 0, 1, 1], [], []>} : vector<16x8xf32>, vector<8x32xf32>, vector<16x32xf32> -> vector<16x32xf32>
    %78 = arith.addf %59, %77 : vector<16x32xf32>
    %79 = vector.extract_strided_slice %41 {offsets = [0, 16], sizes = [16, 8], strides = [1, 1]} : vector<16x96xf32> to vector<16x8xf32>
    %80 = vector.extract_strided_slice %41 {offsets = [0, 48], sizes = [16, 8], strides = [1, 1]} : vector<16x96xf32> to vector<16x8xf32>
    %81 = vector.extract_strided_slice %41 {offsets = [0, 80], sizes = [16, 8], strides = [1, 1]} : vector<16x96xf32> to vector<16x8xf32>
    %cst_38 = arith.constant dense<0.000000e+00> : vector<16x16xf32>
    %82 = tpu.matmul %79, %80, %cst_38 {dimension_numbers = #tpu.dot_dimension_numbers<[1], [1], [0], [0], [0, 0, 1, 0], [], []>} : vector<16x8xf32>, vector<16x8xf32>, vector<16x16xf32> -> vector<16x16xf32>
    %83 = arith.addf %82, %34 : vector<16x16xf32>
    %cst_39 = arith.constant dense<0xFF800000> : vector<16xf32>
    %84 = vector.multi_reduction <maximumf>, %83, %cst_39 [1] : vector<16x16xf32> to vector<16xf32>
    %85 = vector.shape_cast %84 : vector<16xf32> to vector<16x1xf32>
    %86 = vector.broadcast %85 : vector<16x1xf32> to vector<16x16xf32>
    %87 = arith.subf %83, %86 : vector<16x16xf32>
    %88 = math.exp %87 : vector<16x16xf32>
    %cst_40 = arith.constant dense<0.000000e+00> : vector<16xf32>
    %89 = vector.multi_reduction <add>, %88, %cst_40 [1] : vector<16x16xf32> to vector<16xf32>
    %90 = vector.shape_cast %89 : vector<16xf32> to vector<16x1xf32>
    %91 = vector.broadcast %90 : vector<16x1xf32> to vector<16x16xf32>
    %92 = arith.divf %88, %91 : vector<16x16xf32>
    %cst_41 = arith.constant dense<0.000000e+00> : vector<16x8xf32>
    %93 = tpu.matmul %92, %81, %cst_41 {dimension_numbers = #tpu.dot_dimension_numbers<[1], [0], [0], [1], [0, 0, 1, 1], [], []>} : vector<16x16xf32>, vector<16x8xf32>, vector<16x8xf32> -> vector<16x8xf32>
    %c2 = arith.constant 2 : index
    %c0_42 = arith.constant 0 : index
    %c0_43 = arith.constant 0 : index
    %94 = vector.load %arg8[%c2, %c0_42, %c0_43] : memref<8x8x32xf32, #tpu.memory_space<vmem>>, vector<1x8x32xf32>
    %95 = vector.shape_cast %94 : vector<1x8x32xf32> to vector<8x32xf32>
    %cst_44 = arith.constant dense<0.000000e+00> : vector<16x32xf32>
    %96 = tpu.matmul %93, %95, %cst_44 {dimension_numbers = #tpu.dot_dimension_numbers<[1], [0], [0], [1], [0, 0, 1, 1], [], []>} : vector<16x8xf32>, vector<8x32xf32>, vector<16x32xf32> -> vector<16x32xf32>
    %97 = arith.addf %78, %96 : vector<16x32xf32>
    %98 = vector.extract_strided_slice %41 {offsets = [0, 24], sizes = [16, 8], strides = [1, 1]} : vector<16x96xf32> to vector<16x8xf32>
    %99 = vector.extract_strided_slice %41 {offsets = [0, 56], sizes = [16, 8], strides = [1, 1]} : vector<16x96xf32> to vector<16x8xf32>
    %100 = vector.extract_strided_slice %41 {offsets = [0, 88], sizes = [16, 8], strides = [1, 1]} : vector<16x96xf32> to vector<16x8xf32>
    %cst_45 = arith.constant dense<0.000000e+00> : vector<16x16xf32>
    %101 = tpu.matmul %98, %99, %cst_45 {dimension_numbers = #tpu.dot_dimension_numbers<[1], [1], [0], [0], [0, 0, 1, 0], [], []>} : vector<16x8xf32>, vector<16x8xf32>, vector<16x16xf32> -> vector<16x16xf32>
    %102 = arith.addf %101, %34 : vector<16x16xf32>
    %cst_46 = arith.constant dense<0xFF800000> : vector<16xf32>
    %103 = vector.multi_reduction <maximumf>, %102, %cst_46 [1] : vector<16x16xf32> to vector<16xf32>
    %104 = vector.shape_cast %103 : vector<16xf32> to vector<16x1xf32>
    %105 = vector.broadcast %104 : vector<16x1xf32> to vector<16x16xf32>
    %106 = arith.subf %102, %105 : vector<16x16xf32>
    %107 = math.exp %106 : vector<16x16xf32>
    %cst_47 = arith.constant dense<0.000000e+00> : vector<16xf32>
    %108 = vector.multi_reduction <add>, %107, %cst_47 [1] : vector<16x16xf32> to vector<16xf32>
    %109 = vector.shape_cast %108 : vector<16xf32> to vector<16x1xf32>
    %110 = vector.broadcast %109 : vector<16x1xf32> to vector<16x16xf32>
    %111 = arith.divf %107, %110 : vector<16x16xf32>
    %cst_48 = arith.constant dense<0.000000e+00> : vector<16x8xf32>
    %112 = tpu.matmul %111, %100, %cst_48 {dimension_numbers = #tpu.dot_dimension_numbers<[1], [0], [0], [1], [0, 0, 1, 1], [], []>} : vector<16x16xf32>, vector<16x8xf32>, vector<16x8xf32> -> vector<16x8xf32>
    %c3 = arith.constant 3 : index
    %c0_49 = arith.constant 0 : index
    %c0_50 = arith.constant 0 : index
    %113 = vector.load %arg8[%c3, %c0_49, %c0_50] : memref<8x8x32xf32, #tpu.memory_space<vmem>>, vector<1x8x32xf32>
    %114 = vector.shape_cast %113 : vector<1x8x32xf32> to vector<8x32xf32>
    %cst_51 = arith.constant dense<0.000000e+00> : vector<16x32xf32>
    %115 = tpu.matmul %112, %114, %cst_51 {dimension_numbers = #tpu.dot_dimension_numbers<[1], [0], [0], [1], [0, 0, 1, 1], [], []>} : vector<16x8xf32>, vector<8x32xf32>, vector<16x32xf32> -> vector<16x32xf32>
    %116 = arith.addf %97, %115 : vector<16x32xf32>
    %c0_52 = arith.constant 0 : index
    %c0_53 = arith.constant 0 : index
    %c0_54 = arith.constant 0 : index
    %117 = vector.load %arg9[%c0_52, %c0_53, %c0_54] : memref<2x1x32xf32, #tpu.memory_space<vmem>>, vector<1x1x32xf32>
    %118 = vector.shape_cast %117 : vector<1x1x32xf32> to vector<1x32xf32>
    %119 = vector.broadcast %118 : vector<1x32xf32> to vector<16x32xf32>
    %120 = arith.addf %116, %119 : vector<16x32xf32>
    %121 = arith.addf %33, %120 : vector<16x32xf32>
    %c0_55 = arith.constant 0 : index
    %c0_56 = arith.constant 0 : index
    %c0_57 = arith.constant 0 : index
    %122 = vector.load %arg10[%c0_55, %c0_56, %c0_57] : memref<2x1x32xf32, #tpu.memory_space<vmem>>, vector<1x1x32xf32>
    %123 = vector.shape_cast %122 : vector<1x1x32xf32> to vector<1x32xf32>
    %c0_58 = arith.constant 0 : index
    %c0_59 = arith.constant 0 : index
    %c0_60 = arith.constant 0 : index
    %124 = vector.load %arg11[%c0_58, %c0_59, %c0_60] : memref<2x1x32xf32, #tpu.memory_space<vmem>>, vector<1x1x32xf32>
    %125 = vector.shape_cast %124 : vector<1x1x32xf32> to vector<1x32xf32>
    %cst_61 = arith.constant dense<0.000000e+00> : vector<16xf32>
    %126 = vector.multi_reduction <add>, %121, %cst_61 [1] : vector<16x32xf32> to vector<16xf32>
    %127 = vector.shape_cast %126 : vector<16xf32> to vector<16x1xf32>
    %cst_62 = arith.constant 3.200000e+01 : f32
    %128 = vector.broadcast %cst_62 : f32 to vector<16x1xf32>
    %129 = arith.divf %127, %128 : vector<16x1xf32>
    %130 = vector.broadcast %129 : vector<16x1xf32> to vector<16x32xf32>
    %131 = arith.subf %121, %130 : vector<16x32xf32>
    %132 = arith.mulf %131, %131 : vector<16x32xf32>
    %cst_63 = arith.constant dense<0.000000e+00> : vector<16xf32>
    %133 = vector.multi_reduction <add>, %132, %cst_63 [1] : vector<16x32xf32> to vector<16xf32>
    %134 = vector.shape_cast %133 : vector<16xf32> to vector<16x1xf32>
    %cst_64 = arith.constant 3.200000e+01 : f32
    %135 = vector.broadcast %cst_64 : f32 to vector<16x1xf32>
    %136 = arith.divf %134, %135 : vector<16x1xf32>
    %137 = vector.broadcast %129 : vector<16x1xf32> to vector<16x32xf32>
    %138 = arith.subf %121, %137 : vector<16x32xf32>
    %cst_65 = arith.constant 9.99999996E-13 : f32
    %139 = vector.broadcast %cst_65 : f32 to vector<16x1xf32>
    %140 = arith.addf %136, %139 : vector<16x1xf32>
    %141 = math.rsqrt %140 : vector<16x1xf32>
    %142 = vector.broadcast %141 : vector<16x1xf32> to vector<16x32xf32>
    %143 = arith.mulf %138, %142 : vector<16x32xf32>
    %144 = vector.broadcast %123 : vector<1x32xf32> to vector<16x32xf32>
    %145 = arith.mulf %143, %144 : vector<16x32xf32>
    %146 = vector.broadcast %125 : vector<1x32xf32> to vector<16x32xf32>
    %147 = arith.addf %145, %146 : vector<16x32xf32>
    %c0_66 = arith.constant 0 : index
    %c0_67 = arith.constant 0 : index
    %c0_68 = arith.constant 0 : index
    %148 = vector.load %arg12[%c0_66, %c0_67, %c0_68] : memref<2x32x64xf32, #tpu.memory_space<vmem>>, vector<1x32x64xf32>
    %149 = vector.shape_cast %148 : vector<1x32x64xf32> to vector<32x64xf32>
    %cst_69 = arith.constant dense<0.000000e+00> : vector<16x64xf32>
    %150 = tpu.matmul %147, %149, %cst_69 {dimension_numbers = #tpu.dot_dimension_numbers<[1], [0], [0], [1], [0, 0, 1, 1], [], []>} : vector<16x32xf32>, vector<32x64xf32>, vector<16x64xf32> -> vector<16x64xf32>
    %c0_70 = arith.constant 0 : index
    %c0_71 = arith.constant 0 : index
    %c0_72 = arith.constant 0 : index
    %151 = vector.load %arg13[%c0_70, %c0_71, %c0_72] : memref<2x1x64xf32, #tpu.memory_space<vmem>>, vector<1x1x64xf32>
    %152 = vector.shape_cast %151 : vector<1x1x64xf32> to vector<1x64xf32>
    %153 = vector.broadcast %152 : vector<1x64xf32> to vector<16x64xf32>
    %154 = arith.addf %150, %153 : vector<16x64xf32>
    %155 = arith.mulf %154, %154 : vector<16x64xf32>
    %156 = arith.mulf %154, %155 : vector<16x64xf32>
    %cst_73 = arith.constant 4.471500e-02 : f32
    %157 = vector.broadcast %cst_73 : f32 to vector<16x64xf32>
    %158 = arith.mulf %157, %156 : vector<16x64xf32>
    %159 = arith.addf %154, %158 : vector<16x64xf32>
    %cst_74 = arith.constant 0.797884583 : f32
    %160 = vector.broadcast %cst_74 : f32 to vector<16x64xf32>
    %161 = arith.mulf %160, %159 : vector<16x64xf32>
    %162 = math.tanh %161 : vector<16x64xf32>
    %cst_75 = arith.constant 1.000000e+00 : f32
    %163 = vector.broadcast %cst_75 : f32 to vector<16x64xf32>
    %164 = arith.addf %163, %162 : vector<16x64xf32>
    %cst_76 = arith.constant 5.000000e-01 : f32
    %165 = vector.broadcast %cst_76 : f32 to vector<16x64xf32>
    %166 = arith.mulf %165, %164 : vector<16x64xf32>
    %167 = arith.mulf %154, %166 : vector<16x64xf32>
    %c0_77 = arith.constant 0 : index
    %c0_78 = arith.constant 0 : index
    %c0_79 = arith.constant 0 : index
    %168 = vector.load %arg14[%c0_77, %c0_78, %c0_79] : memref<2x64x32xf32, #tpu.memory_space<vmem>>, vector<1x64x32xf32>
    %169 = vector.shape_cast %168 : vector<1x64x32xf32> to vector<64x32xf32>
    %cst_80 = arith.constant dense<0.000000e+00> : vector<16x32xf32>
    %170 = tpu.matmul %167, %169, %cst_80 {dimension_numbers = #tpu.dot_dimension_numbers<[1], [0], [0], [1], [0, 0, 1, 1], [], []>} : vector<16x64xf32>, vector<64x32xf32>, vector<16x32xf32> -> vector<16x32xf32>
    %c0_81 = arith.constant 0 : index
    %c0_82 = arith.constant 0 : index
    %c0_83 = arith.constant 0 : index
    %171 = vector.load %arg15[%c0_81, %c0_82, %c0_83] : memref<2x1x32xf32, #tpu.memory_space<vmem>>, vector<1x1x32xf32>
    %172 = vector.shape_cast %171 : vector<1x1x32xf32> to vector<1x32xf32>
    %173 = vector.broadcast %172 : vector<1x32xf32> to vector<16x32xf32>
    %174 = arith.addf %170, %173 : vector<16x32xf32>
    %175 = arith.addf %147, %174 : vector<16x32xf32>
    %c0_84 = arith.constant 0 : index
    %c0_85 = arith.constant 0 : index
    %c0_86 = arith.constant 0 : index
    %176 = vector.load %arg16[%c0_84, %c0_85, %c0_86] : memref<2x1x32xf32, #tpu.memory_space<vmem>>, vector<1x1x32xf32>
    %177 = vector.shape_cast %176 : vector<1x1x32xf32> to vector<1x32xf32>
    %c0_87 = arith.constant 0 : index
    %c0_88 = arith.constant 0 : index
    %c0_89 = arith.constant 0 : index
    %178 = vector.load %arg17[%c0_87, %c0_88, %c0_89] : memref<2x1x32xf32, #tpu.memory_space<vmem>>, vector<1x1x32xf32>
    %179 = vector.shape_cast %178 : vector<1x1x32xf32> to vector<1x32xf32>
    %cst_90 = arith.constant dense<0.000000e+00> : vector<16xf32>
    %180 = vector.multi_reduction <add>, %175, %cst_90 [1] : vector<16x32xf32> to vector<16xf32>
    %181 = vector.shape_cast %180 : vector<16xf32> to vector<16x1xf32>
    %cst_91 = arith.constant 3.200000e+01 : f32
    %182 = vector.broadcast %cst_91 : f32 to vector<16x1xf32>
    %183 = arith.divf %181, %182 : vector<16x1xf32>
    %184 = vector.broadcast %183 : vector<16x1xf32> to vector<16x32xf32>
    %185 = arith.subf %175, %184 : vector<16x32xf32>
    %186 = arith.mulf %185, %185 : vector<16x32xf32>
    %cst_92 = arith.constant dense<0.000000e+00> : vector<16xf32>
    %187 = vector.multi_reduction <add>, %186, %cst_92 [1] : vector<16x32xf32> to vector<16xf32>
    %188 = vector.shape_cast %187 : vector<16xf32> to vector<16x1xf32>
    %cst_93 = arith.constant 3.200000e+01 : f32
    %189 = vector.broadcast %cst_93 : f32 to vector<16x1xf32>
    %190 = arith.divf %188, %189 : vector<16x1xf32>
    %191 = vector.broadcast %183 : vector<16x1xf32> to vector<16x32xf32>
    %192 = arith.subf %175, %191 : vector<16x32xf32>
    %cst_94 = arith.constant 9.99999996E-13 : f32
    %193 = vector.broadcast %cst_94 : f32 to vector<16x1xf32>
    %194 = arith.addf %190, %193 : vector<16x1xf32>
    %195 = math.rsqrt %194 : vector<16x1xf32>
    %196 = vector.broadcast %195 : vector<16x1xf32> to vector<16x32xf32>
    %197 = arith.mulf %192, %196 : vector<16x32xf32>
    %198 = vector.broadcast %177 : vector<1x32xf32> to vector<16x32xf32>
    %199 = arith.mulf %197, %198 : vector<16x32xf32>
    %200 = vector.broadcast %179 : vector<1x32xf32> to vector<16x32xf32>
    %201 = arith.addf %199, %200 : vector<16x32xf32>
    %c1_95 = arith.constant 1 : index
    %c0_96 = arith.constant 0 : index
    %c0_97 = arith.constant 0 : index
    %202 = vector.load %arg6[%c1_95, %c0_96, %c0_97] : memref<2x32x96xf32, #tpu.memory_space<vmem>>, vector<1x32x96xf32>
    %203 = vector.shape_cast %202 : vector<1x32x96xf32> to vector<32x96xf32>
    %cst_98 = arith.constant dense<0.000000e+00> : vector<16x96xf32>
    %204 = tpu.matmul %201, %203, %cst_98 {dimension_numbers = #tpu.dot_dimension_numbers<[1], [0], [0], [1], [0, 0, 1, 1], [], []>} : vector<16x32xf32>, vector<32x96xf32>, vector<16x96xf32> -> vector<16x96xf32>
    %c1_99 = arith.constant 1 : index
    %c0_100 = arith.constant 0 : index
    %c0_101 = arith.constant 0 : index
    %205 = vector.load %arg7[%c1_99, %c0_100, %c0_101] : memref<2x1x96xf32, #tpu.memory_space<vmem>>, vector<1x1x96xf32>
    %206 = vector.shape_cast %205 : vector<1x1x96xf32> to vector<1x96xf32>
    %207 = vector.broadcast %206 : vector<1x96xf32> to vector<16x96xf32>
    %208 = arith.addf %204, %207 : vector<16x96xf32>
    %209 = vector.extract_strided_slice %208 {offsets = [0, 0], sizes = [16, 8], strides = [1, 1]} : vector<16x96xf32> to vector<16x8xf32>
    %210 = vector.extract_strided_slice %208 {offsets = [0, 32], sizes = [16, 8], strides = [1, 1]} : vector<16x96xf32> to vector<16x8xf32>
    %211 = vector.extract_strided_slice %208 {offsets = [0, 64], sizes = [16, 8], strides = [1, 1]} : vector<16x96xf32> to vector<16x8xf32>
    %cst_102 = arith.constant dense<0.000000e+00> : vector<16x16xf32>
    %212 = tpu.matmul %209, %210, %cst_102 {dimension_numbers = #tpu.dot_dimension_numbers<[1], [1], [0], [0], [0, 0, 1, 0], [], []>} : vector<16x8xf32>, vector<16x8xf32>, vector<16x16xf32> -> vector<16x16xf32>
    %213 = arith.addf %212, %34 : vector<16x16xf32>
    %cst_103 = arith.constant dense<0xFF800000> : vector<16xf32>
    %214 = vector.multi_reduction <maximumf>, %213, %cst_103 [1] : vector<16x16xf32> to vector<16xf32>
    %215 = vector.shape_cast %214 : vector<16xf32> to vector<16x1xf32>
    %216 = vector.broadcast %215 : vector<16x1xf32> to vector<16x16xf32>
    %217 = arith.subf %213, %216 : vector<16x16xf32>
    %218 = math.exp %217 : vector<16x16xf32>
    %cst_104 = arith.constant dense<0.000000e+00> : vector<16xf32>
    %219 = vector.multi_reduction <add>, %218, %cst_104 [1] : vector<16x16xf32> to vector<16xf32>
    %220 = vector.shape_cast %219 : vector<16xf32> to vector<16x1xf32>
    %221 = vector.broadcast %220 : vector<16x1xf32> to vector<16x16xf32>
    %222 = arith.divf %218, %221 : vector<16x16xf32>
    %cst_105 = arith.constant dense<0.000000e+00> : vector<16x8xf32>
    %223 = tpu.matmul %222, %211, %cst_105 {dimension_numbers = #tpu.dot_dimension_numbers<[1], [0], [0], [1], [0, 0, 1, 1], [], []>} : vector<16x16xf32>, vector<16x8xf32>, vector<16x8xf32> -> vector<16x8xf32>
    %c4 = arith.constant 4 : index
    %c0_106 = arith.constant 0 : index
    %c0_107 = arith.constant 0 : index
    %224 = vector.load %arg8[%c4, %c0_106, %c0_107] : memref<8x8x32xf32, #tpu.memory_space<vmem>>, vector<1x8x32xf32>
    %225 = vector.shape_cast %224 : vector<1x8x32xf32> to vector<8x32xf32>
    %cst_108 = arith.constant dense<0.000000e+00> : vector<16x32xf32>
    %226 = tpu.matmul %223, %225, %cst_108 {dimension_numbers = #tpu.dot_dimension_numbers<[1], [0], [0], [1], [0, 0, 1, 1], [], []>} : vector<16x8xf32>, vector<8x32xf32>, vector<16x32xf32> -> vector<16x32xf32>
    %227 = vector.extract_strided_slice %208 {offsets = [0, 8], sizes = [16, 8], strides = [1, 1]} : vector<16x96xf32> to vector<16x8xf32>
    %228 = vector.extract_strided_slice %208 {offsets = [0, 40], sizes = [16, 8], strides = [1, 1]} : vector<16x96xf32> to vector<16x8xf32>
    %229 = vector.extract_strided_slice %208 {offsets = [0, 72], sizes = [16, 8], strides = [1, 1]} : vector<16x96xf32> to vector<16x8xf32>
    %cst_109 = arith.constant dense<0.000000e+00> : vector<16x16xf32>
    %230 = tpu.matmul %227, %228, %cst_109 {dimension_numbers = #tpu.dot_dimension_numbers<[1], [1], [0], [0], [0, 0, 1, 0], [], []>} : vector<16x8xf32>, vector<16x8xf32>, vector<16x16xf32> -> vector<16x16xf32>
    %231 = arith.addf %230, %34 : vector<16x16xf32>
    %cst_110 = arith.constant dense<0xFF800000> : vector<16xf32>
    %232 = vector.multi_reduction <maximumf>, %231, %cst_110 [1] : vector<16x16xf32> to vector<16xf32>
    %233 = vector.shape_cast %232 : vector<16xf32> to vector<16x1xf32>
    %234 = vector.broadcast %233 : vector<16x1xf32> to vector<16x16xf32>
    %235 = arith.subf %231, %234 : vector<16x16xf32>
    %236 = math.exp %235 : vector<16x16xf32>
    %cst_111 = arith.constant dense<0.000000e+00> : vector<16xf32>
    %237 = vector.multi_reduction <add>, %236, %cst_111 [1] : vector<16x16xf32> to vector<16xf32>
    %238 = vector.shape_cast %237 : vector<16xf32> to vector<16x1xf32>
    %239 = vector.broadcast %238 : vector<16x1xf32> to vector<16x16xf32>
    %240 = arith.divf %236, %239 : vector<16x16xf32>
    %cst_112 = arith.constant dense<0.000000e+00> : vector<16x8xf32>
    %241 = tpu.matmul %240, %229, %cst_112 {dimension_numbers = #tpu.dot_dimension_numbers<[1], [0], [0], [1], [0, 0, 1, 1], [], []>} : vector<16x16xf32>, vector<16x8xf32>, vector<16x8xf32> -> vector<16x8xf32>
    %c5 = arith.constant 5 : index
    %c0_113 = arith.constant 0 : index
    %c0_114 = arith.constant 0 : index
    %242 = vector.load %arg8[%c5, %c0_113, %c0_114] : memref<8x8x32xf32, #tpu.memory_space<vmem>>, vector<1x8x32xf32>
    %243 = vector.shape_cast %242 : vector<1x8x32xf32> to vector<8x32xf32>
    %cst_115 = arith.constant dense<0.000000e+00> : vector<16x32xf32>
    %244 = tpu.matmul %241, %243, %cst_115 {dimension_numbers = #tpu.dot_dimension_numbers<[1], [0], [0], [1], [0, 0, 1, 1], [], []>} : vector<16x8xf32>, vector<8x32xf32>, vector<16x32xf32> -> vector<16x32xf32>
    %245 = arith.addf %226, %244 : vector<16x32xf32>
    %246 = vector.extract_strided_slice %208 {offsets = [0, 16], sizes = [16, 8], strides = [1, 1]} : vector<16x96xf32> to vector<16x8xf32>
    %247 = vector.extract_strided_slice %208 {offsets = [0, 48], sizes = [16, 8], strides = [1, 1]} : vector<16x96xf32> to vector<16x8xf32>
    %248 = vector.extract_strided_slice %208 {offsets = [0, 80], sizes = [16, 8], strides = [1, 1]} : vector<16x96xf32> to vector<16x8xf32>
    %cst_116 = arith.constant dense<0.000000e+00> : vector<16x16xf32>
    %249 = tpu.matmul %246, %247, %cst_116 {dimension_numbers = #tpu.dot_dimension_numbers<[1], [1], [0], [0], [0, 0, 1, 0], [], []>} : vector<16x8xf32>, vector<16x8xf32>, vector<16x16xf32> -> vector<16x16xf32>
    %250 = arith.addf %249, %34 : vector<16x16xf32>
    %cst_117 = arith.constant dense<0xFF800000> : vector<16xf32>
    %251 = vector.multi_reduction <maximumf>, %250, %cst_117 [1] : vector<16x16xf32> to vector<16xf32>
    %252 = vector.shape_cast %251 : vector<16xf32> to vector<16x1xf32>
    %253 = vector.broadcast %252 : vector<16x1xf32> to vector<16x16xf32>
    %254 = arith.subf %250, %253 : vector<16x16xf32>
    %255 = math.exp %254 : vector<16x16xf32>
    %cst_118 = arith.constant dense<0.000000e+00> : vector<16xf32>
    %256 = vector.multi_reduction <add>, %255, %cst_118 [1] : vector<16x16xf32> to vector<16xf32>
    %257 = vector.shape_cast %256 : vector<16xf32> to vector<16x1xf32>
    %258 = vector.broadcast %257 : vector<16x1xf32> to vector<16x16xf32>
    %259 = arith.divf %255, %258 : vector<16x16xf32>
    %cst_119 = arith.constant dense<0.000000e+00> : vector<16x8xf32>
    %260 = tpu.matmul %259, %248, %cst_119 {dimension_numbers = #tpu.dot_dimension_numbers<[1], [0], [0], [1], [0, 0, 1, 1], [], []>} : vector<16x16xf32>, vector<16x8xf32>, vector<16x8xf32> -> vector<16x8xf32>
    %c6 = arith.constant 6 : index
    %c0_120 = arith.constant 0 : index
    %c0_121 = arith.constant 0 : index
    %261 = vector.load %arg8[%c6, %c0_120, %c0_121] : memref<8x8x32xf32, #tpu.memory_space<vmem>>, vector<1x8x32xf32>
    %262 = vector.shape_cast %261 : vector<1x8x32xf32> to vector<8x32xf32>
    %cst_122 = arith.constant dense<0.000000e+00> : vector<16x32xf32>
    %263 = tpu.matmul %260, %262, %cst_122 {dimension_numbers = #tpu.dot_dimension_numbers<[1], [0], [0], [1], [0, 0, 1, 1], [], []>} : vector<16x8xf32>, vector<8x32xf32>, vector<16x32xf32> -> vector<16x32xf32>
    %264 = arith.addf %245, %263 : vector<16x32xf32>
    %265 = vector.extract_strided_slice %208 {offsets = [0, 24], sizes = [16, 8], strides = [1, 1]} : vector<16x96xf32> to vector<16x8xf32>
    %266 = vector.extract_strided_slice %208 {offsets = [0, 56], sizes = [16, 8], strides = [1, 1]} : vector<16x96xf32> to vector<16x8xf32>
    %267 = vector.extract_strided_slice %208 {offsets = [0, 88], sizes = [16, 8], strides = [1, 1]} : vector<16x96xf32> to vector<16x8xf32>
    %cst_123 = arith.constant dense<0.000000e+00> : vector<16x16xf32>
    %268 = tpu.matmul %265, %266, %cst_123 {dimension_numbers = #tpu.dot_dimension_numbers<[1], [1], [0], [0], [0, 0, 1, 0], [], []>} : vector<16x8xf32>, vector<16x8xf32>, vector<16x16xf32> -> vector<16x16xf32>
    %269 = arith.addf %268, %34 : vector<16x16xf32>
    %cst_124 = arith.constant dense<0xFF800000> : vector<16xf32>
    %270 = vector.multi_reduction <maximumf>, %269, %cst_124 [1] : vector<16x16xf32> to vector<16xf32>
    %271 = vector.shape_cast %270 : vector<16xf32> to vector<16x1xf32>
    %272 = vector.broadcast %271 : vector<16x1xf32> to vector<16x16xf32>
    %273 = arith.subf %269, %272 : vector<16x16xf32>
    %274 = math.exp %273 : vector<16x16xf32>
    %cst_125 = arith.constant dense<0.000000e+00> : vector<16xf32>
    %275 = vector.multi_reduction <add>, %274, %cst_125 [1] : vector<16x16xf32> to vector<16xf32>
    %276 = vector.shape_cast %275 : vector<16xf32> to vector<16x1xf32>
    %277 = vector.broadcast %276 : vector<16x1xf32> to vector<16x16xf32>
    %278 = arith.divf %274, %277 : vector<16x16xf32>
    %cst_126 = arith.constant dense<0.000000e+00> : vector<16x8xf32>
    %279 = tpu.matmul %278, %267, %cst_126 {dimension_numbers = #tpu.dot_dimension_numbers<[1], [0], [0], [1], [0, 0, 1, 1], [], []>} : vector<16x16xf32>, vector<16x8xf32>, vector<16x8xf32> -> vector<16x8xf32>
    %c7 = arith.constant 7 : index
    %c0_127 = arith.constant 0 : index
    %c0_128 = arith.constant 0 : index
    %280 = vector.load %arg8[%c7, %c0_127, %c0_128] : memref<8x8x32xf32, #tpu.memory_space<vmem>>, vector<1x8x32xf32>
    %281 = vector.shape_cast %280 : vector<1x8x32xf32> to vector<8x32xf32>
    %cst_129 = arith.constant dense<0.000000e+00> : vector<16x32xf32>
    %282 = tpu.matmul %279, %281, %cst_129 {dimension_numbers = #tpu.dot_dimension_numbers<[1], [0], [0], [1], [0, 0, 1, 1], [], []>} : vector<16x8xf32>, vector<8x32xf32>, vector<16x32xf32> -> vector<16x32xf32>
    %283 = arith.addf %264, %282 : vector<16x32xf32>
    %c1_130 = arith.constant 1 : index
    %c0_131 = arith.constant 0 : index
    %c0_132 = arith.constant 0 : index
    %284 = vector.load %arg9[%c1_130, %c0_131, %c0_132] : memref<2x1x32xf32, #tpu.memory_space<vmem>>, vector<1x1x32xf32>
    %285 = vector.shape_cast %284 : vector<1x1x32xf32> to vector<1x32xf32>
    %286 = vector.broadcast %285 : vector<1x32xf32> to vector<16x32xf32>
    %287 = arith.addf %283, %286 : vector<16x32xf32>
    %288 = arith.addf %201, %287 : vector<16x32xf32>
    %c1_133 = arith.constant 1 : index
    %c0_134 = arith.constant 0 : index
    %c0_135 = arith.constant 0 : index
    %289 = vector.load %arg10[%c1_133, %c0_134, %c0_135] : memref<2x1x32xf32, #tpu.memory_space<vmem>>, vector<1x1x32xf32>
    %290 = vector.shape_cast %289 : vector<1x1x32xf32> to vector<1x32xf32>
    %c1_136 = arith.constant 1 : index
    %c0_137 = arith.constant 0 : index
    %c0_138 = arith.constant 0 : index
    %291 = vector.load %arg11[%c1_136, %c0_137, %c0_138] : memref<2x1x32xf32, #tpu.memory_space<vmem>>, vector<1x1x32xf32>
    %292 = vector.shape_cast %291 : vector<1x1x32xf32> to vector<1x32xf32>
    %cst_139 = arith.constant dense<0.000000e+00> : vector<16xf32>
    %293 = vector.multi_reduction <add>, %288, %cst_139 [1] : vector<16x32xf32> to vector<16xf32>
    %294 = vector.shape_cast %293 : vector<16xf32> to vector<16x1xf32>
    %cst_140 = arith.constant 3.200000e+01 : f32
    %295 = vector.broadcast %cst_140 : f32 to vector<16x1xf32>
    %296 = arith.divf %294, %295 : vector<16x1xf32>
    %297 = vector.broadcast %296 : vector<16x1xf32> to vector<16x32xf32>
    %298 = arith.subf %288, %297 : vector<16x32xf32>
    %299 = arith.mulf %298, %298 : vector<16x32xf32>
    %cst_141 = arith.constant dense<0.000000e+00> : vector<16xf32>
    %300 = vector.multi_reduction <add>, %299, %cst_141 [1] : vector<16x32xf32> to vector<16xf32>
    %301 = vector.shape_cast %300 : vector<16xf32> to vector<16x1xf32>
    %cst_142 = arith.constant 3.200000e+01 : f32
    %302 = vector.broadcast %cst_142 : f32 to vector<16x1xf32>
    %303 = arith.divf %301, %302 : vector<16x1xf32>
    %304 = vector.broadcast %296 : vector<16x1xf32> to vector<16x32xf32>
    %305 = arith.subf %288, %304 : vector<16x32xf32>
    %cst_143 = arith.constant 9.99999996E-13 : f32
    %306 = vector.broadcast %cst_143 : f32 to vector<16x1xf32>
    %307 = arith.addf %303, %306 : vector<16x1xf32>
    %308 = math.rsqrt %307 : vector<16x1xf32>
    %309 = vector.broadcast %308 : vector<16x1xf32> to vector<16x32xf32>
    %310 = arith.mulf %305, %309 : vector<16x32xf32>
    %311 = vector.broadcast %290 : vector<1x32xf32> to vector<16x32xf32>
    %312 = arith.mulf %310, %311 : vector<16x32xf32>
    %313 = vector.broadcast %292 : vector<1x32xf32> to vector<16x32xf32>
    %314 = arith.addf %312, %313 : vector<16x32xf32>
    %c1_144 = arith.constant 1 : index
    %c0_145 = arith.constant 0 : index
    %c0_146 = arith.constant 0 : index
    %315 = vector.load %arg12[%c1_144, %c0_145, %c0_146] : memref<2x32x64xf32, #tpu.memory_space<vmem>>, vector<1x32x64xf32>
    %316 = vector.shape_cast %315 : vector<1x32x64xf32> to vector<32x64xf32>
    %cst_147 = arith.constant dense<0.000000e+00> : vector<16x64xf32>
    %317 = tpu.matmul %314, %316, %cst_147 {dimension_numbers = #tpu.dot_dimension_numbers<[1], [0], [0], [1], [0, 0, 1, 1], [], []>} : vector<16x32xf32>, vector<32x64xf32>, vector<16x64xf32> -> vector<16x64xf32>
    %c1_148 = arith.constant 1 : index
    %c0_149 = arith.constant 0 : index
    %c0_150 = arith.constant 0 : index
    %318 = vector.load %arg13[%c1_148, %c0_149, %c0_150] : memref<2x1x64xf32, #tpu.memory_space<vmem>>, vector<1x1x64xf32>
    %319 = vector.shape_cast %318 : vector<1x1x64xf32> to vector<1x64xf32>
    %320 = vector.broadcast %319 : vector<1x64xf32> to vector<16x64xf32>
    %321 = arith.addf %317, %320 : vector<16x64xf32>
    %322 = arith.mulf %321, %321 : vector<16x64xf32>
    %323 = arith.mulf %321, %322 : vector<16x64xf32>
    %cst_151 = arith.constant 4.471500e-02 : f32
    %324 = vector.broadcast %cst_151 : f32 to vector<16x64xf32>
    %325 = arith.mulf %324, %323 : vector<16x64xf32>
    %326 = arith.addf %321, %325 : vector<16x64xf32>
    %cst_152 = arith.constant 0.797884583 : f32
    %327 = vector.broadcast %cst_152 : f32 to vector<16x64xf32>
    %328 = arith.mulf %327, %326 : vector<16x64xf32>
    %329 = math.tanh %328 : vector<16x64xf32>
    %cst_153 = arith.constant 1.000000e+00 : f32
    %330 = vector.broadcast %cst_153 : f32 to vector<16x64xf32>
    %331 = arith.addf %330, %329 : vector<16x64xf32>
    %cst_154 = arith.constant 5.000000e-01 : f32
    %332 = vector.broadcast %cst_154 : f32 to vector<16x64xf32>
    %333 = arith.mulf %332, %331 : vector<16x64xf32>
    %334 = arith.mulf %321, %333 : vector<16x64xf32>
    %c1_155 = arith.constant 1 : index
    %c0_156 = arith.constant 0 : index
    %c0_157 = arith.constant 0 : index
    %335 = vector.load %arg14[%c1_155, %c0_156, %c0_157] : memref<2x64x32xf32, #tpu.memory_space<vmem>>, vector<1x64x32xf32>
    %336 = vector.shape_cast %335 : vector<1x64x32xf32> to vector<64x32xf32>
    %cst_158 = arith.constant dense<0.000000e+00> : vector<16x32xf32>
    %337 = tpu.matmul %334, %336, %cst_158 {dimension_numbers = #tpu.dot_dimension_numbers<[1], [0], [0], [1], [0, 0, 1, 1], [], []>} : vector<16x64xf32>, vector<64x32xf32>, vector<16x32xf32> -> vector<16x32xf32>
    %c1_159 = arith.constant 1 : index
    %c0_160 = arith.constant 0 : index
    %c0_161 = arith.constant 0 : index
    %338 = vector.load %arg15[%c1_159, %c0_160, %c0_161] : memref<2x1x32xf32, #tpu.memory_space<vmem>>, vector<1x1x32xf32>
    %339 = vector.shape_cast %338 : vector<1x1x32xf32> to vector<1x32xf32>
    %340 = vector.broadcast %339 : vector<1x32xf32> to vector<16x32xf32>
    %341 = arith.addf %337, %340 : vector<16x32xf32>
    %342 = arith.addf %314, %341 : vector<16x32xf32>
    %c1_162 = arith.constant 1 : index
    %c0_163 = arith.constant 0 : index
    %c0_164 = arith.constant 0 : index
    %343 = vector.load %arg16[%c1_162, %c0_163, %c0_164] : memref<2x1x32xf32, #tpu.memory_space<vmem>>, vector<1x1x32xf32>
    %344 = vector.shape_cast %343 : vector<1x1x32xf32> to vector<1x32xf32>
    %c1_165 = arith.constant 1 : index
    %c0_166 = arith.constant 0 : index
    %c0_167 = arith.constant 0 : index
    %345 = vector.load %arg17[%c1_165, %c0_166, %c0_167] : memref<2x1x32xf32, #tpu.memory_space<vmem>>, vector<1x1x32xf32>
    %346 = vector.shape_cast %345 : vector<1x1x32xf32> to vector<1x32xf32>
    %cst_168 = arith.constant dense<0.000000e+00> : vector<16xf32>
    %347 = vector.multi_reduction <add>, %342, %cst_168 [1] : vector<16x32xf32> to vector<16xf32>
    %348 = vector.shape_cast %347 : vector<16xf32> to vector<16x1xf32>
    %cst_169 = arith.constant 3.200000e+01 : f32
    %349 = vector.broadcast %cst_169 : f32 to vector<16x1xf32>
    %350 = arith.divf %348, %349 : vector<16x1xf32>
    %351 = vector.broadcast %350 : vector<16x1xf32> to vector<16x32xf32>
    %352 = arith.subf %342, %351 : vector<16x32xf32>
    %353 = arith.mulf %352, %352 : vector<16x32xf32>
    %cst_170 = arith.constant dense<0.000000e+00> : vector<16xf32>
    %354 = vector.multi_reduction <add>, %353, %cst_170 [1] : vector<16x32xf32> to vector<16xf32>
    %355 = vector.shape_cast %354 : vector<16xf32> to vector<16x1xf32>
    %cst_171 = arith.constant 3.200000e+01 : f32
    %356 = vector.broadcast %cst_171 : f32 to vector<16x1xf32>
    %357 = arith.divf %355, %356 : vector<16x1xf32>
    %358 = vector.broadcast %350 : vector<16x1xf32> to vector<16x32xf32>
    %359 = arith.subf %342, %358 : vector<16x32xf32>
    %cst_172 = arith.constant 9.99999996E-13 : f32
    %360 = vector.broadcast %cst_172 : f32 to vector<16x1xf32>
    %361 = arith.addf %357, %360 : vector<16x1xf32>
    %362 = math.rsqrt %361 : vector<16x1xf32>
    %363 = vector.broadcast %362 : vector<16x1xf32> to vector<16x32xf32>
    %364 = arith.mulf %359, %363 : vector<16x32xf32>
    %365 = vector.broadcast %344 : vector<1x32xf32> to vector<16x32xf32>
    %366 = arith.mulf %364, %365 : vector<16x32xf32>
    %367 = vector.broadcast %346 : vector<1x32xf32> to vector<16x32xf32>
    %368 = arith.addf %366, %367 : vector<16x32xf32>
    %369 = tpu.iota {dimensions = array<i32: 1>} : vector<2x16xi32>
    %370 = tpu.iota {dimensions = array<i32: 0>} : vector<2x16xi32>
    %c8_i32 = arith.constant 8 : i32
    %371 = vector.broadcast %c8_i32 : i32 to vector<2x16xi32>
    %372 = arith.muli %370, %371 : vector<2x16xi32>
    %373 = arith.cmpi eq, %369, %372 : vector<2x16xi32>
    %374 = arith.extui %373 : vector<2x16xi1> to vector<2x16xi32>
    %375 = arith.sitofp %374 : vector<2x16xi32> to vector<2x16xf32>
    %cst_173 = arith.constant dense<0.000000e+00> : vector<2x32xf32>
    %376 = tpu.matmul %375, %368, %cst_173 {dimension_numbers = #tpu.dot_dimension_numbers<[1], [0], [0], [1], [0, 0, 1, 1], [], []>} : vector<2x16xf32>, vector<16x32xf32>, vector<2x32xf32> -> vector<2x32xf32>
    %c0_174 = arith.constant 0 : index
    %c0_175 = arith.constant 0 : index
    %377 = vector.load %arg19[%c0_174, %c0_175] : memref<32x64xf32, #tpu.memory_space<vmem>>, vector<32x64xf32>
    %cst_176 = arith.constant dense<0.000000e+00> : vector<2x64xf32>
    %378 = tpu.matmul %376, %377, %cst_176 {dimension_numbers = #tpu.dot_dimension_numbers<[1], [0], [0], [1], [0, 0, 1, 1], [], []>} : vector<2x32xf32>, vector<32x64xf32>, vector<2x64xf32> -> vector<2x64xf32>
    %c0_177 = arith.constant 0 : index
    %c0_178 = arith.constant 0 : index
    %379 = vector.load %arg18[%c0_177, %c0_178] : memref<2x9xf32, #tpu.memory_space<vmem>>, vector<2x9xf32>
    %c0_179 = arith.constant 0 : index
    %c0_180 = arith.constant 0 : index
    %380 = vector.load %arg20[%c0_179, %c0_180] : memref<9x64xf32, #tpu.memory_space<vmem>>, vector<9x64xf32>
    %cst_181 = arith.constant dense<0.000000e+00> : vector<2x64xf32>
    %381 = tpu.matmul %379, %380, %cst_181 {dimension_numbers = #tpu.dot_dimension_numbers<[1], [0], [0], [1], [0, 0, 1, 1], [], []>} : vector<2x9xf32>, vector<9x64xf32>, vector<2x64xf32> -> vector<2x64xf32>
    %382 = arith.addf %378, %381 : vector<2x64xf32>
    %c0_182 = arith.constant 0 : index
    %c0_183 = arith.constant 0 : index
    %383 = vector.load %arg21[%c0_182, %c0_183] : memref<1x64xf32, #tpu.memory_space<vmem>>, vector<1x64xf32>
    %384 = vector.broadcast %383 : vector<1x64xf32> to vector<2x64xf32>
    %385 = arith.addf %382, %384 : vector<2x64xf32>
    %cst_184 = arith.constant 0.000000e+00 : f32
    %386 = vector.broadcast %cst_184 : f32 to vector<2x64xf32>
    %387 = arith.maximumf %385, %386 : vector<2x64xf32>
    %c0_185 = arith.constant 0 : index
    %c0_186 = arith.constant 0 : index
    %388 = vector.load %arg22[%c0_185, %c0_186] : memref<64x1xf32, #tpu.memory_space<vmem>>, vector<64x1xf32>
    %cst_187 = arith.constant dense<0.000000e+00> : vector<2x1xf32>
    %389 = tpu.matmul %387, %388, %cst_187 {dimension_numbers = #tpu.dot_dimension_numbers<[1], [0], [0], [1], [0, 0, 1, 1], [], []>} : vector<2x64xf32>, vector<64x1xf32>, vector<2x1xf32> -> vector<2x1xf32>
    %c0_188 = arith.constant 0 : index
    %c0_189 = arith.constant 0 : index
    %390 = vector.load %arg23[%c0_188, %c0_189] : memref<1x1xf32, #tpu.memory_space<vmem>>, vector<1x1xf32>
    %391 = vector.broadcast %390 : vector<1x1xf32> to vector<2x1xf32>
    %392 = arith.addf %389, %391 : vector<2x1xf32>
    %c0_190 = arith.constant 0 : index
    %c0_191 = arith.constant 0 : index
    %393 = vector.load %arg24[%c0_190, %c0_191] : memref<2x1xf32, #tpu.memory_space<vmem>>, vector<2x1xf32>
    tpu.vector_store %arg24[%c0_190, %c0_191], %392 {strides = array<i32>} : memref<2x1xf32, #tpu.memory_space<vmem>>, vector<2x1xf32>,
    return
  }
}

</mosaic_0001>

<bundles_post_ra>
// kernel: traffy_bert_regressor_forward.1
= control target key start
LH: loop header
LB: loop body
LE: loop exit
PB: predicated region body
PF: predicated region fallthrough
CT: control target
= control target key end

     0   :  { %v4680_v0 = vmov 0   ;;  %v81_v27 = vlaneseq  ;;  %v4681_v30 = vmov 1.0   ;;  %vm190_vm2 = vcmask 261120   ;;  %s5453_s29 = smov 72   ;;  %s5416_s0 = inlined_call_operand.vmem [shape: s32[16,1], index: 0, kind: input, shape index: {}]   ;;  %s5417_s2 = inlined_call_operand.vmem [shape: f32[128,32], index: 2, kind: input, shape index: {}]   ;;  %s5418_s3 = inlined_call_operand.vmem [shape: f32[16,32], index: 3, kind: input, shape index: {}]   ;;  %s5419_s6 = inlined_call_operand.vmem [shape: f32[2,32,96], index: 6, kind: input, shape index: {}]   ;;  %s5420_s4 = inlined_call_operand.vmem [shape: f32[1,32], index: 4, kind: input, shape index: {}]   ;;  %s5421_s5 = inlined_call_operand.vmem [shape: f32[1,32], index: 5, kind: input, shape index: {}]   ;;  %s5422_s7 = inlined_call_operand.vmem [shape: f32[2,1,96], index: 7, kind: input, shape index: {}]   ;;  %s5423_s1 = inlined_call_operand.vmem [shape: f32[16,16], index: 1, kind: input, shape index: {}]   ;;  %s5424_s8 = inlined_call_operand.vmem [shape: f32[8,8,32], index: 8, kind: input, shape index: {}]   ;;  %s5425_s9 = inlined_call_operand.vmem [shape: f32[2,1,32], index: 9, kind: input, shape index: {}]   ;;  %s5426_s12 = inlined_call_operand.vmem [shape: f32[2,32,64], index: 12, kind: input, shape index: {}]   ;;  %s5427_s10 = inlined_call_operand.vmem [shape: f32[2,1,32], index: 10, kind: input, shape index: {}]   ;;  %s5428_s11 = inlined_call_operand.vmem [shape: f32[2,1,32], index: 11, kind: input, shape index: {}]   ;;  %s5429_s14 = inlined_call_operand.vmem [shape: f32[2,64,32], index: 14, kind: input, shape index: {}]   ;;  %s5430_s13 = inlined_call_operand.vmem [shape: f32[2,1,64], index: 13, kind: input, shape index: {}]   ;;  %s5431_s15 = inlined_call_operand.vmem [shape: f32[2,1,32], index: 15, kind: input, shape index: {}]   ;;  %s5432_s16 = inlined_call_operand.vmem [shape: f32[2,1,32], index: 16, kind: input, shape index: {}]   ;;  %s5433_s17 = inlined_call_operand.vmem [shape: f32[2,1,32], index: 17, kind: input, shape index: {}]   ;;  %s5434_s20 = inlined_call_operand.vmem [shape: f32[9,64], index: 20, kind: input, shape index: {}]   ;;  %s5435_s19 = inlined_call_operand.vmem [shape: f32[32,64], index: 19, kind: input, shape index: {}]   ;;  %s5436_s18 = inlined_call_operand.vmem [shape: f32[2,9], index: 18, kind: input, shape index: {}]   ;;  %s5437_s22 = inlined_call_operand.vmem [shape: f32[64,1], index: 22, kind: input, shape index: {}]   ;;  %s5438_s23 = inlined_call_operand.<no memory space> [shape: f32[1,1], index: 23, kind: input, shape index: {}]   ;;  %s5439_s21 = inlined_call_operand.vmem [shape: f32[1,64], index: 21, kind: input, shape index: {}]   ;;  %s5440_s24 = inlined_call_operand.vmem [shape: f32[2,1], index: 24, kind: output, shape index: {}]  }
   0x1   :  { %5458 = sst [smem:[#allocation3_spill]] %s5416_s0  ;;  %4505 = vset.pattern.permute.xlu0 %v4680_v0  ;;  %vm334_vm3 = vcmask 64512   ;;  %vm418_vm5 = vcmask 130048   ;;  %vm1643_vm6 = vcmask 523264   ;;  %vm4694_vm7 = vmmov 0  }
   0x2   :  { %5459 = sst [smem:[#allocation4_spill]] %s5417_s2  ;;  %s5467_s27 = sld [smem:[#allocation3_spill]]  ;;  %v4877_v28 = vand.u32 127, %v81_v27  ;;  %vm4934_vm4 = vmpackc.low %vm334_vm3, %vm334_vm3  ;;  %vm3405_vm9 = vcmask 1040384   ;;  %vm4696_vm10 = vmmov 1   ;;  %vm3401_vm12 = vcmask 72704  }
   0x3   :  { %5460 = sst [smem:[#allocation5_spill]] %s5418_s3  ;;  %s5468_s3 = sld [smem:[#allocation4_spill]]  ;;  %vm4456_vm11 = vmpackc.low %vm3405_vm9, %vm4696_vm10  ;;  %vm3649_vm13 = vcmask 1024  }
   0x4   :  { %5461 = sst [smem:[#allocation6_spill]] %s5419_s6  ;;  %s5469_s25 = sld [smem:[#allocation5_spill]] }
   0x5   :  { %5462 = sst [smem:[#allocation7_spill]] %s5420_s4  ;;  %s5470_s26 = sld [smem:[#allocation6_spill]] }
   0x6   :  { %5463 = sst [smem:[#allocation8_spill]] %s5421_s5  ;;  %s5471_s6 = sld [smem:[#allocation7_spill]] }
   0x7   :  { %5464 = sst [smem:[#allocation9_spill]] %s5422_s7  ;;  %s5472_s4 = sld [smem:[#allocation8_spill]] }
   0x8   :  { %5465 = sst [smem:[#allocation10_spill]] %s5423_s1  ;;  %v79_v1 = vld [vmem:[%s5467_s27] sm:$0xff]  ;;  %v80_v6 = vld [vmem:[%s5467_s27 + $0x8] sm:$0xff]  ;;  %s5473_s28 = sld [smem:[#allocation9_spill]] }
   0x9   :  { %5466 = sst [smem:[#allocation11_spill]] %s5424_s8  ;;  %v95_v2 = vld [vmem:[%s5468_s3] sm:$0xff]  ;;  %84 = vperm.xlu0 %4505, %v79_v1   ;;  %v96_v3 = vld [vmem:[%s5468_s3 + $0x8] sm:$0xff]  ;;  %v97_v4 = vld [vmem:[%s5468_s3 + $0x10] sm:$0xff]  ;;  %s4682_s7 = smov 96  }
   0xa   :  { %v98_v5 = vld [vmem:[%s5468_s3 + $0x18] sm:$0xff]  ;;  %v4275_v7 = vpack.c.bf16 %v96_v3, %v95_v2  ;;  %v99_v9 = vld [vmem:[%s5468_s3 + $0x20] sm:$0xff]  ;;  %v100_v10 = vld [vmem:[%s5468_s3 + $0x28] sm:$0xff]  ;;  %s5476_s0 = sld [smem:[#allocation10_spill]]  ;;  %s5448_s8 = smov 56  }
   0xb   :  { %v4279_v8 = vpack.c.bf16 %v98_v5, %v97_v4  ;;  %v4283_v11 = vpack.c.bf16 %v100_v10, %v99_v9  ;;  %v101_v12 = vld [vmem:[%s5468_s3 + $0x30] sm:$0xff]  ;;  %v102_v13 = vld [vmem:[%s5468_s3 + $0x38] sm:$0xff]  ;;  %v103_v15 = vld [vmem:[%s5468_s3 + $0x40] sm:$0xff]  ;;  %s5451_s2 = smov 104   ;;  %s5457_s5 = smov 80  }
   0xc   :  { %4276 = vmatprep.subr.bf16.mxu0 %v4275_v7  ;;  %v4287_v14 = vpack.c.bf16 %v102_v13, %v101_v12  ;;  %v104_v16 = vld [vmem:[%s5468_s3 + $0x48] sm:$0xff]  ;;  %v105_v18 = vld [vmem:[%s5468_s3 + $0x50] sm:$0xff]  ;;  %v106_v19 = vld [vmem:[%s5468_s3 + $0x58] sm:$0xff]  ;;  %s5477_s30 = sld [smem:[#allocation11_spill]]  ;;  %s5450_s1 = smov 40  }
   0xd   :  { %87 = vperm.xlu0 %4505, %v80_v6   ;;  %4278 = vmatpush3.bf16.msra.mxu0 %v4275_v7  ;;  %v4291_v17 = vpack.c.bf16 %v104_v16, %v103_v15  ;;  %v4295_v20 = vpack.c.bf16 %v106_v19, %v105_v18  ;;  %v107_v21 = vld [vmem:[%s5468_s3 + $0x60] sm:$0xff]  ;;  %v108_v22 = vld [vmem:[%s5468_s3 + $0x68] sm:$0xff]  ;;  %v109_v24 = vld [vmem:[%s5468_s3 + $0x70] sm:$0xff]  ;;  %s5483_s27 = smov 56  }
   0xe   :  { %4280 = vmatprep.subr.bf16.mxu0 %v4279_v8  ;;  %v4299_v23 = vpack.c.bf16 %v108_v22, %v107_v21  ;;  %v110_v25 = vld [vmem:[%s5468_s3 + $0x78] sm:$0xff]  ;;  %v111_v32 = vld [vmem:[%s5469_s25] sm:$0xff]  ;;  %v112_v34 = vld [vmem:[%s5469_s25 + $0x8] sm:$0xff]  ;;  %s4683_s3 = smov 88   ;;  %s4685_s25 = smov 120  }
   0xf   :  { %v4303_v26 = vpack.c.bf16 %v110_v25, %v109_v24  ;;  %v236_v50 = vld [vmem:[%s5470_s26] sm:$0xff]  ;;  %v237_v51 = vld [vmem:[%s5470_s26 + $0x8] sm:$0xff]  ;;  %v238_v52 = vld [vmem:[%s5470_s26 + $0x10] sm:$0xff] }
  0x10   :  { %v4307_v53 = vpack.c.bf16 %v237_v51, %v236_v50  ;;  %v239_v54 = vld [vmem:[%s5470_s26 + $0x18] sm:$0xff]  ;;  %v3659_v63 = vld [vmem:[%s5471_s6] ss:$0 sm:$0xff]  ;;  %v4947_v19 = vld [vmem:[%s5476_s0 + $0x8] sm:$0xff]  ;;  %s5454_s6 = smov 64  }
  0x11   :  { %4282 = vmatpush3.bf16.msra.mxu0 %v4279_v8  ;;  %v4311_v55 = vpack.c.bf16 %v239_v54, %v238_v52  ;;  %v3660_v1 = vld [vmem:[%s5472_s4] ss:$0 sm:$0xff]  ;;  %s5455_s4 = smov 112  }
  0x12   :  { %4284 = vmatprep.subr.bf16.mxu0 %v4283_v11  ;;  %4308 = vmatprep.subr.bf16.mxu1 %v4307_v53  ;;  %v3661_v8 = vld [vmem:[%s5473_s28] ss:$0 sm:$0xff] }
  0x13   :  { %4310 = vmatpush3.bf16.msra.mxu1 %v4307_v53 }
  0x14   :  { %4312 = vmatprep.subr.bf16.mxu1 %v4311_v55 }
  0x15   :  { %4286 = vmatpush3.bf16.msra.mxu0 %v4283_v11 }
  0x16   :  { %4288 = vmatprep.subr.bf16.mxu0 %v4287_v14 }
  0x17   :  { %4314 = vmatpush3.bf16.msra.mxu1 %v4311_v55 }
  0x19   :  { %4290 = vmatpush3.bf16.msra.mxu0 %v4287_v14 }
  0x1a   :  { %4292 = vmatprep.subr.bf16.mxu0 %v4291_v17 }
  0x1d   :  { %4294 = vmatpush3.bf16.msra.mxu0 %v4291_v17 }
  0x1e   :  { %4296 = vmatprep.subr.bf16.mxu0 %v4295_v20 }
  0x21   :  { %4298 = vmatpush3.bf16.msra.mxu0 %v4295_v20  ;;  %v4952_v20 = vld [vmem:[%s5476_s0] sm:$0xff] }
  0x22   :  { %4300 = vmatprep.subr.bf16.mxu0 %v4299_v23 }
  0x25   :  { %4302 = vmatpush3.bf16.msra.mxu0 %v4299_v23 }
  0x26   :  { %4304 = vmatprep.subr.bf16.mxu0 %v4303_v26 }
  0x29   :  { %4306 = vmatpush3.bf16.msra.mxu0 %v4303_v26 }
  0x88   :  { %v85_v29 = vpop.permute.xlu0 %84 }
  0x89   :  { %vm89_vm0 = vcmp.eq.s32.totalorder %v4877_v28, %v85_v29 }
  0x8a   :  { %3994 = vmatprep.mubr.msk.f32.mxu0 %vm89_vm0, %v4681_v30 }
  0x8c   :  { %v88_v31 = vpop.permute.xlu0 %87 }
  0x8d   :  { %vm90_vm1 = vcmp.eq.s32.totalorder %v4877_v28, %v88_v31 }
  0x8e   :  { %3995 = vmatmul.mubr.msk.f32.vlgmr.msra.gmra.mrb[0].mxu0 %vm90_vm1, %v4681_v30 }
 0x161   :  { %v3996_v33 = vpop.f32.mrb[0].mxu0 }
 0x162   :  { %v179_v35 = vpop.f32.mrb[1].mxu0  ;;  %v185_v37 = vadd.f32 %v3996_v33, %v112_v34 }
 0x163   :  { %v180_v36 = vadd.f32 %v179_v35, %v111_v32 }
 0x164   :  { %v194_v39 = vsel %vm190_vm2, %v185_v37, 0.0 }
 0x165   :  { %v191_v38 = vsel %vm190_vm2, %v180_v36, 0.0 }
 0x166   :  { %192 = vadd.xlane.f32.xlu1 %v191_v38 }
 0x16a   :  { %195 = vadd.xlane.f32.xlu1 %v194_v39 }
 0x1f3   :  { %v193_v40 = vpop.xlane.xlu1 %192 }
 0x1f4   :  { %v198_v41 = vmul.f32 0.03125, %v193_v40 }
 0x1f6   :  { %v200_v42 = vsub.f32 %v180_v36, %v198_v41 }
 0x1f7   :  { %v196_v43 = vpop.xlane.xlu1 %195 }
 0x1f8   :  { %v199_v44 = vmul.f32 0.03125, %v196_v43  ;;  %v202_v45 = vmul.f32 %v200_v42, %v200_v42 }
 0x1fa   :  { %v201_v46 = vsub.f32 %v185_v37, %v199_v44  ;;  %v204_v47 = vsel %vm190_vm2, %v202_v45, 0.0 }
 0x1fb   :  { %205 = vadd.xlane.f32.xlu0 %v204_v47 }
 0x1fc   :  { %v203_v48 = vmul.f32 %v201_v46, %v201_v46 }
 0x1fe   :  { %v207_v49 = vsel %vm190_vm2, %v203_v48, 0.0 }
 0x1ff   :  { %208 = vadd.xlane.f32.xlu1 %v207_v49 }
 0x288   :  { %v206_v56 = vpop.xlane.xlu0 %205 }
 0x289   :  { %v210_v57 = vmul.f32 0.03125, %v206_v56 }
 0x28b   :  { %v212_v58 = vadd.f32 1e-12, %v210_v57 }
 0x28c   :  { %v209_v59 = vpop.xlane.xlu1 %208 }
 0x28d   :  { %4586 = vrsqrt.f32 %v212_v58  ;;  %v211_v60 = vmul.f32 0.03125, %v209_v59 }
 0x28f   :  { %v213_v61 = vadd.f32 1e-12, %v211_v60 }
 0x291   :  { %4588 = vrsqrt.f32 %v213_v61 }
 0x297   :  { %v4587_v62 = vpop.eup %4586 }
 0x298   :  { %v216_v0 = vmul.f32 %v4587_v62, %v200_v42 }
 0x29a   :  { %v224_v2 = vmul.f32 %v3659_v63, %v216_v0 }
 0x29b   :  { %v4589_v3 = vpop.eup %4588 }
 0x29c   :  { %v217_v4 = vmul.f32 %v4589_v3, %v201_v46  ;;  %v4909_v5 = vadd.f32 %v3660_v1, %v224_v2 }
 0x29e   :  { %v225_v6 = vmul.f32 %v3659_v63, %v217_v4  ;;  %4005 = vmatprep.mubr.msk.f32.mxu1 %vm190_vm2, %v4909_v5 }
 0x2a0   :  { %v4913_v7 = vadd.f32 %v3660_v1, %v225_v6 }
 0x2a2   :  { %4006 = vmatmul.mubr.msk.f32.vlgmr.msra.gmra.mrb[0].mxu1 %vm190_vm2, %v4913_v7 }
 0x375   :  { %v4007_v9 = vpop.f32.mrb[0].mxu1 }
 0x376   :  { %v4920_v10 = vadd.f32 %v4007_v9, %v3661_v8  ;;  %v319_v11 = vpop.f32.mrb[1].mxu1 }
 0x377   :  { %v4922_v12 = vadd.f32 %v3661_v8, %v319_v11 }
 0x379   :  { %4012 = vmatprep.mubr.msk.f32.mxu1 %vm334_vm3, %v4922_v12  ;;  %v4928_v13 = vpack.i.bf16 %v4920_v10, %v4922_v12 }
 0x37b   :  { %4507 = vrot.lane.b32.xlu1 %v4928_v13, %s4682_s7 }
 0x3ed   :  { %v4508_v14 = vpop.permute.xlu1 %4507 }
 0x3ee   :  { %v4510_v15 = vunpack.i.h.bf16 %v4508_v14  ;;  %v4509_v16 = vunpack.i.l.bf16 %v4508_v14 }
 0x3f0   :  { %v4315_v18 = vpack.c.bf16 %v4510_v15, %v4509_v16 }
 0x3f2   :  { %4317 = vmatprep.subr.msk.bf16.mxu1 %vm4934_vm4, %v4315_v18 }
 0x3f3   :  { %4320 = vmatpush3.bf16.xpose.msk.msra.mxu1 %vm4934_vm4, %v4315_v18  ;;  %v3676_v18 = vld [vmem:[%s5477_s30 + $0x8] sm:$0xff] }
 0x3fa   :  { %4013 = vmatmul.mubr.msk.f32.vlgmr.msra.gmra.mrb[2].mxu1 %vm334_vm3, %v4920_v10 }
 0x4cd   :  { %v4014_v21 = vpop.f32.mrb[2].mxu1 }
 0x4ce   :  { %v415_v22 = vadd.f32 %v4014_v21, %v4947_v19  ;;  %v409_v23 = vpop.f32.mrb[3].mxu1 }
 0x4cf   :  { %v410_v24 = vadd.f32 %v409_v23, %v4952_v20 }
 0x4d0   :  { %v422_v25 = vsel %vm418_vm5, %v415_v22, -inf }
 0x4d1   :  { %423 = vmax.xlane.f32.xlu0 %v422_v25  ;;  %v419_v26 = vsel %vm418_vm5, %v410_v24, -inf }
 0x4d2   :  { %420 = vmax.xlane.f32.xlu1 %v419_v26 }
 0x4e3   :  { %4517 = vrot.lane.b32.xlu1 %v4928_v13, %s4683_s3 }
 0x4e7   :  { %4512 = vrot.lane.b32.xlu0 %v4928_v13, %s5454_s6 }
 0x55e   :  { %v424_v29 = vpop.xlane.xlu0 %423 }
 0x55f   :  { %v426_v30 = vsub.f32 %v415_v22, %v424_v29  ;;  %v421_v31 = vpop.xlane.xlu1 %420  ;;  %v528_v29 = vld [vmem:[%s5477_s30] sm:$0xff] }
 0x560   :  { %v425_v32 = vsub.f32 %v410_v24, %v421_v31 }
 0x561   :  { %v429_v33 = vmul.f32 1.442695, %v426_v30 }
 0x562   :  { %v427_v34 = vmul.f32 1.442695, %v425_v32  ;;  %v4513_v35 = vpop.permute.xlu0 %4512 }
 0x563   :  { %4590 = vpow2.f32 %v429_v33  ;;  %v4515_v36 = vunpack.i.h.bf16 %v4513_v35  ;;  %v4514_v37 = vunpack.i.l.bf16 %v4513_v35  ;;  %v4518_v38 = vpop.permute.xlu1 %4517 }
 0x564   :  { %v4520_v39 = vunpack.i.h.bf16 %v4518_v38  ;;  %v4519_v40 = vunpack.i.l.bf16 %v4518_v38  ;;  %4592 = vpow2.f32 %v427_v34 }
 0x565   :  { %v4321_v41 = vpack.c.bf16 %v4515_v36, %v4514_v37 }
 0x566   :  { %v4325_v42 = vpack.c.bf16 %v4520_v39, %v4519_v40 }
 0x567   :  { %4322 = vmatprep.subr.bf16.mxu1 %v4321_v41 }
 0x568   :  { %4324 = vmatpush3.bf16.msra.mxu1 %v4321_v41 }
 0x569   :  { %4327 = vmatprep.subr.msk.bf16.mxu1 %vm4934_vm4, %v4325_v42 }
 0x56d   :  { %v4591_v43 = vpop.eup %4590 }
 0x56e   :  { %v434_v44 = vsel %vm418_vm5, %v4591_v43, 0.0  ;;  %v4593_v45 = vpop.eup %4592 }
 0x56f   :  { %435 = vadd.xlane.f32.xlu0 %v434_v44  ;;  %v431_v46 = vsel %vm418_vm5, %v4593_v45, 0.0 }
 0x573   :  { %432 = vadd.xlane.f32.xlu0 %v431_v46 }
 0x589   :  { %529 = vrot.lane.b32.xlu0 %v4922_v12, %s4685_s25 }
 0x58d   :  { %531 = vrot.lane.b32.xlu0 %v4920_v10, %s4685_s25 }
 0x5fc   :  { %v436_v47 = vpop.xlane.xlu0 %435 }
 0x5fd   :  { %4594 = vrcp.f32 %v436_v47 }
 0x600   :  { %v433_v48 = vpop.xlane.xlu0 %432 }
 0x601   :  { %4596 = vrcp.f32 %v433_v48 }
 0x604   :  { %v530_v53 = vpop.permute.xlu0 %529 }
 0x607   :  { %v4595_v49 = vpop.eup %4594 }
 0x608   :  { %v440_v52 = vmul.f32 %v4595_v49, %v4591_v43  ;;  %v532_v54 = vpop.permute.xlu0 %531 }
 0x60b   :  { %v4597_v50 = vpop.eup %4596 }
 0x60c   :  { %v438_v51 = vmul.f32 %v4597_v50, %v4593_v45 }
 0x60e   :  { %4019 = vmatprep.mubr.msk.f32.mxu1 %vm418_vm5, %v438_v51 }
 0x60f   :  { %4020 = vmatmul.mubr.msk.f32.vlgmr.msra.gmra.mrb[4].mxu1 %vm418_vm5, %v440_v52 }
 0x610   :  { %4330 = vmatpush3.bf16.xpose.msk.msra.mxu1 %vm4934_vm4, %v4325_v42  ;;  %4026 = vmatprep.mubr.msk.f32.mxu1 %vm334_vm3, %v530_v53 }
 0x617   :  { %4027 = vmatmul.mubr.msk.f32.vlgmr.msra.gmra.mrb[6].mxu1 %vm334_vm3, %v532_v54 }
 0x6e2   :  { %v4976_v55 = vpop.f32.mrb[4].mxu1 }
 0x6e3   :  { %v4978_v56 = vpop.f32.mrb[5].mxu1 }
 0x6ea   :  { %v4028_v57 = vpop.f32.mrb[6].mxu1 }
 0x6eb   :  { %v617_v58 = vadd.f32 %v4028_v57, %v4947_v19  ;;  %v611_v59 = vpop.f32.mrb[7].mxu1 }
 0x6ec   :  { %v612_v60 = vadd.f32 %v611_v59, %v4952_v20 }
 0x6ed   :  { %v623_v61 = vsel %vm418_vm5, %v617_v58, -inf }
 0x6ee   :  { %624 = vmax.xlane.f32.xlu1 %v623_v61  ;;  %v620_v62 = vsel %vm418_vm5, %v612_v60, -inf }
 0x6ef   :  { %621 = vmax.xlane.f32.xlu0 %v620_v62 }
 0x6ff   :  { %4522 = vrot.lane.b32.xlu1 %v4928_v13, %s5448_s8  ;;  %s5449_s8 = smov 48  }
 0x703   :  { %893 = vrot.lane.b32.xlu1 %v4922_v12, %s5455_s4 }
 0x707   :  { %895 = vrot.lane.b32.xlu1 %v4920_v10, %s5455_s4 }
 0x70b   :  { %1178 = vrot.lane.b32.xlu1 %v4922_v12, %s5451_s2 }
 0x77b   :  { %v625_v63 = vpop.xlane.xlu1 %624 }
 0x77c   :  { %v627_v0 = vsub.f32 %v617_v58, %v625_v63  ;;  %v622_v1 = vpop.xlane.xlu0 %621 }
 0x77d   :  { %v626_v2 = vsub.f32 %v612_v60, %v622_v1 }
 0x77e   :  { %v630_v3 = vmul.f32 1.442695, %v627_v0 }
 0x77f   :  { %v628_v4 = vmul.f32 1.442695, %v626_v2  ;;  %v4523_v6 = vpop.permute.xlu1 %4522 }
 0x780   :  { %v4525_v8 = vunpack.i.h.bf16 %v4523_v6  ;;  %v4524_v9 = vunpack.i.l.bf16 %v4523_v6 }
 0x781   :  { %4598 = vpow2.f32 %v628_v4 }
 0x782   :  { %v4331_v11 = vpack.c.bf16 %v4525_v8, %v4524_v9  ;;  %4600 = vpow2.f32 %v630_v3 }
 0x783   :  { %v894_v36 = vpop.permute.xlu1 %893 }
 0x784   :  { %4332 = vmatprep.subr.bf16.mxu1 %v4331_v11 }
 0x785   :  { %4334 = vmatpush3.bf16.msra.mxu1 %v4331_v11 }
 0x786   :  { %4036 = vmatprep.subr.mxu1 %v3676_v18 }
 0x787   :  { %v896_v40 = vpop.permute.xlu1 %895 }
 0x78b   :  { %v4599_v14 = vpop.eup %4598  ;;  %v1179_v41 = vpop.permute.xlu1 %1178 }
 0x78c   :  { %v632_v15 = vsel %vm418_vm5, %v4599_v14, 0.0  ;;  %v4601_v16 = vpop.eup %4600 }
 0x78d   :  { %633 = vadd.xlane.f32.xlu0 %v632_v15  ;;  %v635_v12 = vsel %vm418_vm5, %v4601_v16, 0.0 }
 0x791   :  { %636 = vadd.xlane.f32.xlu0 %v635_v12 }
 0x7a7   :  { %4527 = vrot.lane.b32.xlu0 %v4928_v13, %s5457_s5 }
 0x7ab   :  { %4532 = vrot.lane.b32.xlu0 %v4928_v13, %s5453_s29  ;;  %s5479_s29 = smov 112  }
 0x7af   :  { %1180 = vrot.lane.b32.xlu0 %v4920_v10, %s5451_s2 }
 0x81a   :  { %v634_v21 = vpop.xlane.xlu0 %633 }
 0x81b   :  { %4602 = vrcp.f32 %v634_v21 }
 0x81e   :  { %v637_v22 = vpop.xlane.xlu0 %636 }
 0x81f   :  { %4604 = vrcp.f32 %v637_v22 }
 0x822   :  { %v4528_v30 = vpop.permute.xlu0 %4527 }
 0x823   :  { %v4530_v10 = vunpack.i.h.bf16 %v4528_v30  ;;  %v4529_v31 = vunpack.i.l.bf16 %v4528_v30 }
 0x825   :  { %v4603_v23 = vpop.eup %4602  ;;  %v4335_v34 = vpack.c.bf16 %v4530_v10, %v4529_v31  ;;  %v3687_v31 = vld [vmem:[%s5477_s30 + $0x10] sm:$0xff] }
 0x826   :  { %v639_v24 = vmul.f32 %v4603_v23, %v4599_v14  ;;  %v4533_v35 = vpop.permute.xlu0 %4532 }
 0x827   :  { %v4535_v37 = vunpack.i.h.bf16 %v4533_v35  ;;  %v4534_v38 = vunpack.i.l.bf16 %v4533_v35 }
 0x828   :  { %4033 = vmatprep.mubr.msk.f32.mxu1 %vm418_vm5, %v639_v24 }
 0x829   :  { %v4605_v25 = vpop.eup %4604  ;;  %v4345_v39 = vpack.c.bf16 %v4535_v37, %v4534_v38 }
 0x82a   :  { %v641_v26 = vmul.f32 %v4605_v25, %v4601_v16  ;;  %v1181_v42 = vpop.permute.xlu0 %1180 }
 0x82c   :  { %4034 = vmatmul.mubr.msk.f32.vlgmr.msra.gmra.mrb[8].mxu1 %vm418_vm5, %v641_v26 }
 0x82d   :  { %4037 = vmatpush3.msra.mxu1 %v3676_v18 }
 0x82e   :  { %4041 = vmatprep.subr.mxu1 %v528_v29 }
 0x8ff   :  { %v4035_v32 = vpop.f32.mrb[8].mxu1 }
 0x900   :  { %v720_v33 = vpop.f32.mrb[9].mxu1 }
 0x901   :  { %4038 = vmatprep.mubr.msk.f32.mxu1 %vm334_vm3, %v720_v33 }
 0x902   :  { %4039 = vmatmul.mubr.msk.f32.vlgmr.msra.gmra.mrb[10].mxu1 %vm334_vm3, %v4035_v32 }
 0x903   :  { %4042 = vmatpush3.msra.mxu1 %v528_v29  ;;  %4043 = vmatprep.mubr.msk.f32.mxu1 %vm334_vm3, %v4978_v56 }
 0x904   :  { %4337 = vmatprep.subr.msk.bf16.mxu1 %vm4934_vm4, %v4335_v34 }
 0x90a   :  { %4044 = vmatmul.mubr.msk.f32.vlgmr.msra.gmra.mrb[10].mxu1 %vm334_vm3, %v4976_v55 }
 0x90b   :  { %4340 = vmatpush3.bf16.xpose.msk.msra.mxu1 %vm4934_vm4, %v4335_v34  ;;  %4050 = vmatprep.mubr.msk.f32.mxu1 %vm334_vm3, %v894_v36 }
 0x90c   :  { %4347 = vmatprep.subr.msk.bf16.mxu1 %vm4934_vm4, %v4345_v39 }
 0x912   :  { %4051 = vmatmul.mubr.msk.f32.vlgmr.msra.gmra.mrb[12].mxu1 %vm334_vm3, %v896_v40 }
 0x913   :  { %4350 = vmatpush3.bf16.xpose.msk.msra.mxu1 %vm4934_vm4, %v4345_v39  ;;  %4069 = vmatprep.mubr.msk.f32.mxu1 %vm334_vm3, %v1179_v41 }
 0x91a   :  { %4070 = vmatmul.mubr.msk.f32.vlgmr.msra.gmra.mrb[14].mxu1 %vm334_vm3, %v1181_v42  ;;  %v3696_v42 = vld [vmem:[%s5477_s30 + $0x18] sm:$0xff] }
 0x9dd   :  { %v5026_v43 = vpop.f32.mrb[10].mxu1 }
 0x9de   :  { %v5028_v44 = vpop.f32.mrb[11].mxu1 }
 0x9e5   :  { %v4052_v45 = vpop.f32.mrb[12].mxu1 }
 0x9e6   :  { %v981_v46 = vadd.f32 %v4052_v45, %v4947_v19  ;;  %v975_v47 = vpop.f32.mrb[13].mxu1 }
 0x9e7   :  { %v976_v48 = vadd.f32 %v975_v47, %v4952_v20 }
 0x9e8   :  { %v987_v49 = vsel %vm418_vm5, %v981_v46, -inf }
 0x9e9   :  { %988 = vmax.xlane.f32.xlu0 %v987_v49  ;;  %v984_v50 = vsel %vm418_vm5, %v976_v48, -inf  ;;  %v3699_v49 = vld [vmem:[%s5425_s9] ss:$0 sm:$0xff] }
 0x9ea   :  { %985 = vmax.xlane.f32.xlu1 %v984_v50 }
 0x9ed   :  { %v4071_v51 = vpop.f32.mrb[14].mxu1 }
 0x9ee   :  { %v1260_v52 = vpop.f32.mrb[15].mxu1  ;;  %v1266_v0 = vadd.f32 %v4071_v51, %v4947_v19 }
 0x9ef   :  { %v1261_v61 = vadd.f32 %v1260_v52, %v4952_v20 }
 0x9f0   :  { %v1272_v2 = vsel %vm418_vm5, %v1266_v0, -inf }
 0x9f1   :  { %v1269_v1 = vsel %vm418_vm5, %v1261_v61, -inf }
 0xa76   :  { %v989_v53 = vpop.xlane.xlu0 %988 }
 0xa77   :  { %v991_v54 = vsub.f32 %v981_v46, %v989_v53  ;;  %v986_v55 = vpop.xlane.xlu1 %985 }
 0xa78   :  { %v990_v56 = vsub.f32 %v976_v48, %v986_v55 }
 0xa79   :  { %v994_v57 = vmul.f32 1.442695, %v991_v54 }
 0xa7a   :  { %v992_v58 = vmul.f32 1.442695, %v990_v56 }
 0xa7b   :  { %4606 = vpow2.f32 %v994_v57 }
 0xa7c   :  { %4608 = vpow2.f32 %v992_v58 }
 0xa85   :  { %v4607_v59 = vpop.eup %4606 }
 0xa86   :  { %v4609_v60 = vpop.eup %4608  ;;  %v999_v62 = vsel %vm418_vm5, %v4607_v59, 0.0 }
 0xa87   :  { %1000 = vadd.xlane.f32.xlu1 %v999_v62  ;;  %v996_v63 = vsel %vm418_vm5, %v4609_v60, 0.0 }
 0xa88   :  { %997 = vadd.xlane.f32.xlu0 %v996_v63 }
 0xa8b   :  { %1270 = vmax.xlane.f32.xlu1 %v1269_v1 }
 0xa8f   :  { %1273 = vmax.xlane.f32.xlu1 %v1272_v2  ;;  %v1519_v2 = vld [vmem:[%s5426_s12 + $0x8] sm:$0xff] }
 0xa9e   :  { %4537 = vrot.lane.b32.xlu0 %v4928_v13, %s5449_s8  ;;  %s5484_s8 = smov 48  }
 0xb14   :  { %v1001_v3 = vpop.xlane.xlu1 %1000 }
 0xb15   :  { %4610 = vrcp.f32 %v1001_v3  ;;  %v998_v4 = vpop.xlane.xlu0 %997 }
 0xb16   :  { %4612 = vrcp.f32 %v998_v4  ;;  %v1520_v4 = vld [vmem:[%s5426_s12 + $0x10] sm:$0xff] }
 0xb18   :  { %v1271_v6 = vpop.xlane.xlu1 %1270 }
 0xb19   :  { %v4538_v8 = vpop.permute.xlu0 %4537  ;;  %v1275_v14 = vsub.f32 %v1261_v61, %v1271_v6  ;;  %v1521_v6 = vld [vmem:[%s5426_s12 + $0x18] sm:$0xff] }
 0xb1a   :  { %v4540_v9 = vunpack.i.h.bf16 %v4538_v8  ;;  %v4539_v11 = vunpack.i.l.bf16 %v4538_v8  ;;  %v4359_v8 = vpack.c.bf16 %v1521_v6, %v1520_v4 }
 0xb1b   :  { %v1277_v21 = vmul.f32 1.442695, %v1275_v14 }
 0xb1c   :  { %v4341_v15 = vpack.c.bf16 %v4540_v9, %v4539_v11  ;;  %v1274_v16 = vpop.xlane.xlu1 %1273 }
 0xb1d   :  { %v1276_v12 = vsub.f32 %v1266_v0, %v1274_v16 }
 0xb1e   :  { %4342 = vmatprep.subr.bf16.mxu0 %v4341_v15 }
 0xb1f   :  { %v4611_v18 = vpop.eup %4610  ;;  %v1279_v22 = vmul.f32 1.442695, %v1276_v12  ;;  %4344 = vmatpush3.bf16.msra.mxu0 %v4341_v15 }
 0xb20   :  { %v4613_v23 = vpop.eup %4612  ;;  %v1005_v25 = vmul.f32 %v4611_v18, %v4607_v59  ;;  %4060 = vmatprep.subr.mxu0 %v3687_v31 }
 0xb21   :  { %4614 = vpow2.f32 %v1279_v22  ;;  %v1003_v24 = vmul.f32 %v4613_v23, %v4609_v60  ;;  %v3701_v23 = vld [vmem:[%s5428_s11] ss:$0 sm:$0xff] }
 0xb22   :  { %4616 = vpow2.f32 %v1277_v21  ;;  %v3700_v21 = vld [vmem:[%s5427_s10] ss:$0 sm:$0xff] }
 0xb23   :  { %4057 = vmatprep.mubr.msk.f32.mxu0 %vm418_vm5, %v1003_v24 }
 0xb24   :  { %4058 = vmatmul.mubr.msk.f32.vlgmr.msra.gmra.mrb[2].mxu0 %vm418_vm5, %v1005_v25 }
 0xb25   :  { %4061 = vmatpush3.msra.mxu0 %v3687_v31  ;;  %v1628_v31 = vld [vmem:[%s5429_s14] sm:$0xff] }
 0xb2b   :  { %v4615_v26 = vpop.eup %4614 }
 0xb2c   :  { %v1284_v29 = vsel %vm418_vm5, %v4615_v26, 0.0  ;;  %v4617_v30 = vpop.eup %4616 }
 0xb2d   :  { %1285 = vadd.xlane.f32.xlu1 %v1284_v29  ;;  %v1281_v10 = vsel %vm418_vm5, %v4617_v30, 0.0 }
 0xb31   :  { %1282 = vadd.xlane.f32.xlu1 %v1281_v10 }
 0xb42   :  { %4542 = vrot.lane.b32.xlu1 %v4928_v13, %s5450_s1 }
 0xbba   :  { %v1286_v32 = vpop.xlane.xlu1 %1285 }
 0xbbe   :  { %v1283_v33 = vpop.xlane.xlu1 %1282 }
 0xbbf   :  { %4618 = vrcp.f32 %v1283_v33 }
 0xbc0   :  { %4620 = vrcp.f32 %v1286_v32  ;;  %v1629_v32 = vld [vmem:[%s5429_s14 + $0x8] sm:$0xff] }
 0xbc1   :  { %v4363_v33 = vpack.c.bf16 %v1629_v32, %v1628_v31 }
 0xbc2   :  { %v4543_v34 = vpop.permute.xlu1 %4542 }
 0xbc3   :  { %v4545_v35 = vunpack.i.h.bf16 %v4543_v34  ;;  %v4544_v36 = vunpack.i.l.bf16 %v4543_v34  ;;  %v1630_v34 = vld [vmem:[%s5429_s14 + $0x10] sm:$0xff] }
 0xbc5   :  { %v4351_v37 = vpack.c.bf16 %v4545_v35, %v4544_v36  ;;  %v1631_v35 = vld [vmem:[%s5429_s14 + $0x18] sm:$0xff] }
 0xbc6   :  { %v4367_v36 = vpack.c.bf16 %v1631_v35, %v1630_v34 }
 0xbc7   :  { %4352 = vmatprep.subr.bf16.mxu0 %v4351_v37 }
 0xbc9   :  { %v4619_v38 = vpop.eup %4618 }
 0xbca   :  { %v4621_v41 = vpop.eup %4620  ;;  %v1288_v13 = vmul.f32 %v4619_v38, %v4617_v30  ;;  %v1633_v38 = vld [vmem:[%s5429_s14 + $0x28] sm:$0xff] }
 0xbcb   :  { %v1290_v45 = vmul.f32 %v4621_v41, %v4615_v26  ;;  %v1635_v41 = vld [vmem:[%s5429_s14 + $0x38] sm:$0xff] }
 0xbf7   :  { %v4059_v39 = vpop.f32.mrb[2].mxu0 }
 0xbf8   :  { %v1084_v40 = vpop.f32.mrb[3].mxu0 }
 0xbf9   :  { %4062 = vmatprep.mubr.msk.f32.mxu0 %vm334_vm3, %v1084_v40  ;;  %v1634_v40 = vld [vmem:[%s5429_s14 + $0x30] sm:$0xff] }
 0xbfa   :  { %4063 = vmatmul.mubr.msk.f32.vlgmr.msra.gmra.mrb[4].mxu0 %vm334_vm3, %v4059_v39 }
 0xbfb   :  { %4354 = vmatpush3.bf16.msra.mxu0 %v4351_v37  ;;  %4076 = vmatprep.mubr.msk.f32.mxu0 %vm418_vm5, %v1288_v13  ;;  %v1632_v37 = vld [vmem:[%s5429_s14 + $0x20] sm:$0xff]  ;;  %v4375_v13 = vpack.c.bf16 %v1635_v41, %v1634_v40 }
 0xbfc   :  { %4079 = vmatprep.subr.mxu0 %v3696_v42  ;;  %v4371_v39 = vpack.c.bf16 %v1633_v38, %v1632_v37  ;;  %v3709_v41 = vld [vmem:[%s5433_s17] ss:$0 sm:$0xff] }
 0xbfe   :  { %4077 = vmatmul.mubr.msk.f32.vlgmr.msra.gmra.mrb[6].mxu0 %vm418_vm5, %v1290_v45 }
 0xbff   :  { %4080 = vmatpush3.msra.mxu0 %v3696_v42  ;;  %v3702_v42 = vld [vmem:[%s5430_s13] ss:$0 sm:$0xff] }
 0xc00   :  { %4364 = vmatprep.subr.bf16.mxu0 %v4363_v33 }
 0xcd1   :  { %v4078_v46 = vpop.f32.mrb[6].mxu0 }
 0xcd2   :  { %v1369_v47 = vpop.f32.mrb[7].mxu0 }
 0xcd3   :  { %4081 = vmatprep.mubr.msk.f32.mxu0 %vm334_vm3, %v1369_v47 }
 0xcd4   :  { %4082 = vmatmul.mubr.msk.f32.vlgmr.msra.gmra.mrb[4].mxu0 %vm334_vm3, %v4078_v46 }
 0xcd5   :  { %4366 = vmatpush3.bf16.msra.mxu0 %v4363_v33 }
 0xcd6   :  { %4368 = vmatprep.subr.bf16.mxu0 %v4367_v36 }
 0xcd9   :  { %4370 = vmatpush3.bf16.msra.mxu0 %v4367_v36 }
 0xcda   :  { %4372 = vmatprep.subr.bf16.mxu0 %v4371_v39 }
 0xcdd   :  { %4374 = vmatpush3.bf16.msra.mxu0 %v4371_v39  ;;  %v3708_v39 = vld [vmem:[%s5432_s16] ss:$0 sm:$0xff] }
 0xcde   :  { %4376 = vmatprep.subr.bf16.mxu0 %v4375_v13 }
 0xce1   :  { %4378 = vmatpush3.bf16.msra.mxu0 %v4375_v13 }
 0xda7   :  { %v4083_v48 = vpop.f32.mrb[4].mxu0 }
 0xda8   :  { %v4476_v50 = vadd.f32 %v4083_v48, %v5026_v43  ;;  %v1452_v51 = vpop.f32.mrb[5].mxu0 }
 0xda9   :  { %v4477_v52 = vadd.f32 %v1452_v51, %v5028_v44 }
 0xdaa   :  { %v1471_v53 = vadd.f32 %v4476_v50, %v3699_v49 }
 0xdab   :  { %v1470_v54 = vadd.f32 %v4477_v52, %v3699_v49 }
 0xdac   :  { %v1473_v55 = vadd.f32 %v1471_v53, %v4913_v7 }
 0xdad   :  { %v1472_v56 = vadd.f32 %v1470_v54, %v4909_v5  ;;  %v1518_v5 = vld [vmem:[%s5426_s12] sm:$0xff] }
 0xdae   :  { %v1479_v57 = vsel %vm190_vm2, %v1473_v55, 0.0  ;;  %v4355_v3 = vpack.c.bf16 %v1519_v2, %v1518_v5 }
 0xdaf   :  { %1480 = vadd.xlane.f32.xlu1 %v1479_v57  ;;  %v1476_v58 = vsel %vm190_vm2, %v1472_v56, 0.0 }
 0xdb0   :  { %1477 = vadd.xlane.f32.xlu0 %v1476_v58  ;;  %4356 = vmatprep.subr.bf16.mxu1 %v4355_v3 }
 0xdb1   :  { %4358 = vmatpush3.bf16.msra.mxu1 %v4355_v3 }
 0xdb2   :  { %4360 = vmatprep.subr.bf16.mxu1 %v4359_v8 }
 0xdb5   :  { %4362 = vmatpush3.bf16.msra.mxu1 %v4359_v8 }
 0xe3c   :  { %v1481_v59 = vpop.xlane.xlu1 %1480 }
 0xe3d   :  { %v1483_v60 = vmul.f32 0.03125, %v1481_v59  ;;  %v1478_v61 = vpop.xlane.xlu0 %1477 }
 0xe3e   :  { %v1482_v62 = vmul.f32 0.03125, %v1478_v61 }
 0xe3f   :  { %v1485_v43 = vsub.f32 %v1473_v55, %v1483_v60 }
 0xe40   :  { %v1484_v63 = vsub.f32 %v1472_v56, %v1482_v62 }
 0xe41   :  { %v1487_v1 = vmul.f32 %v1485_v43, %v1485_v43 }
 0xe42   :  { %v1486_v0 = vmul.f32 %v1484_v63, %v1484_v63 }
 0xe43   :  { %v1491_v7 = vsel %vm190_vm2, %v1487_v1, 0.0  ;;  %v3705_v1 = vld [vmem:[%s5431_s15] ss:$0 sm:$0xff] }
 0xe44   :  { %v1488_v44 = vsel %vm190_vm2, %v1486_v0, 0.0 }
 0xe45   :  { %1489 = vadd.xlane.f32.xlu0 %v1488_v44 }
 0xe49   :  { %1492 = vadd.xlane.f32.xlu0 %v1491_v7 }
 0xed2   :  { %v1490_v9 = vpop.xlane.xlu0 %1489 }
 0xed3   :  { %v1494_v11 = vmul.f32 0.03125, %v1490_v9 }
 0xed5   :  { %v1496_v14 = vadd.f32 1e-12, %v1494_v11 }
 0xed6   :  { %v1493_v15 = vpop.xlane.xlu0 %1492 }
 0xed7   :  { %4622 = vrsqrt.f32 %v1496_v14  ;;  %v1495_v16 = vmul.f32 0.03125, %v1493_v15 }
 0xed9   :  { %v1497_v12 = vadd.f32 1e-12, %v1495_v16 }
 0xedb   :  { %4624 = vrsqrt.f32 %v1497_v12 }
 0xee1   :  { %v4623_v18 = vpop.eup %4622 }
 0xee2   :  { %v1500_v22 = vmul.f32 %v4623_v18, %v1484_v63 }
 0xee4   :  { %v1508_v24 = vmul.f32 %v3700_v21, %v1500_v22 }
 0xee5   :  { %v4625_v25 = vpop.eup %4624 }
 0xee6   :  { %v1501_v26 = vmul.f32 %v4625_v25, %v1485_v43  ;;  %v1516_v29 = vadd.f32 %v3701_v23, %v1508_v24  ;;  %v3710_v25 = vld [vmem:[%s5470_s26 + $0x20] sm:$0xff] }
 0xee8   :  { %v1509_v30 = vmul.f32 %v3700_v21, %v1501_v26  ;;  %4092 = vmatprep.mubr.msk.f32.mxu1 %vm190_vm2, %v1516_v29  ;;  %v3711_v26 = vld [vmem:[%s5470_s26 + $0x28] sm:$0xff] }
 0xeea   :  { %v1517_v10 = vadd.f32 %v3701_v23, %v1509_v30  ;;  %v3712_v30 = vld [vmem:[%s5470_s26 + $0x30] sm:$0xff] }
 0xeec   :  { %4093 = vmatmul.mubr.msk.f32.vlgmr.msra.gmra.mrb[16].mxu1 %vm190_vm2, %v1517_v10 }
 0xfbf   :  { %v4094_v45 = vpop.f32.mrb[16].mxu1 }
 0xfc0   :  { %v1607_v46 = vadd.f32 %v4094_v45, %v3702_v42  ;;  %v1601_v47 = vpop.f32.mrb[17].mxu1 }
 0xfc1   :  { %v1602_v48 = vadd.f32 %v3702_v42, %v1601_v47 }
 0xfc2   :  { %v1611_v49 = vmul.f32 %v1607_v46, %v1607_v46 }
 0xfc3   :  { %v1610_v50 = vmul.f32 %v1602_v48, %v1602_v48 }
 0xfc4   :  { %v1613_v51 = vmul.f32 %v1611_v49, %v1607_v46  ;;  %v3715_v49 = vld [vmem:[%s5473_s28 + $0x1] ss:$0 sm:$0xff]  ;;  %s5478_s28 = smov 80  }
 0xfc5   :  { %v1612_v52 = vmul.f32 %v1610_v50, %v1602_v48 }
 0xfc6   :  { %v1615_v53 = vmul.f32 0.044715, %v1613_v51 }
 0xfc7   :  { %v1614_v54 = vmul.f32 0.044715, %v1612_v52 }
 0xfc8   :  { %v1617_v55 = vadd.f32 %v1615_v53, %v1607_v46 }
 0xfc9   :  { %v1616_v56 = vadd.f32 %v1614_v54, %v1602_v48 }
 0xfca   :  { %v1619_v57 = vmul.f32 0.7978846, %v1617_v55 }
 0xfcb   :  { %v1618_v58 = vmul.f32 0.7978846, %v1616_v56 }
 0xfcc   :  { %4626 = vtanh.f32 %v1619_v57 }
 0xfcd   :  { %4628 = vtanh.f32 %v1618_v58 }
 0xfd6   :  { %v4627_v59 = vpop.eup %4626 }
 0xfd7   :  { %v4629_v60 = vpop.eup %4628  ;;  %v1623_v61 = vadd.f32 1.0, %v4627_v59 }
 0xfd8   :  { %v1622_v62 = vadd.f32 1.0, %v4629_v60 }
 0xfd9   :  { %v1625_v43 = vmul.f32 0.5, %v1623_v61 }
 0xfda   :  { %v1624_v63 = vmul.f32 0.5, %v1622_v62 }
 0xfdb   :  { %v1627_v44 = vmul.f32 %v1625_v43, %v1607_v46 }
 0xfdc   :  { %v1626_v0 = vmul.f32 %v1624_v63, %v1602_v48 }
 0xfde   :  { %4111 = vmatprep.mubr.msk.f32.mxu0 %vm1643_vm6, %v1626_v0 }
 0xfdf   :  { %4112 = vmatmul.mubr.msk.f32.vlgmr.msra.gmra.mrb[8].mxu0 %vm1643_vm6, %v1627_v44 }
0x10b2   :  { %v4113_v7 = vpop.f32.mrb[8].mxu0 }
0x10b3   :  { %v1716_v5 = vpop.f32.mrb[9].mxu0  ;;  %v1722_v2 = vadd.f32 %v4113_v7, %v3705_v1 }
0x10b4   :  { %v1717_v3 = vadd.f32 %v3705_v1, %v1716_v5 }
0x10b5   :  { %v1726_v8 = vadd.f32 %v1722_v2, %v1517_v10  ;;  %v3713_v10 = vld [vmem:[%s5470_s26 + $0x38] sm:$0xff] }
0x10b6   :  { %v1725_v4 = vadd.f32 %v1717_v3, %v1516_v29  ;;  %v4379_v29 = vpack.c.bf16 %v3711_v26, %v3710_v25  ;;  %v4383_v31 = vpack.c.bf16 %v3713_v10, %v3712_v30 }
0x10b7   :  { %v1732_v9 = vsel %vm190_vm2, %v1726_v8, 0.0 }
0x10b8   :  { %v1729_v6 = vsel %vm190_vm2, %v1725_v4, 0.0  ;;  %4380 = vmatprep.subr.bf16.mxu1 %v4379_v29 }
0x10b9   :  { %1730 = vadd.xlane.f32.xlu0 %v1729_v6  ;;  %4382 = vmatpush3.bf16.msra.mxu1 %v4379_v29 }
0x10ba   :  { %4384 = vmatprep.subr.bf16.mxu1 %v4383_v31 }
0x10bd   :  { %1733 = vadd.xlane.f32.xlu0 %v1732_v9  ;;  %4386 = vmatpush3.bf16.msra.mxu1 %v4383_v31 }
0x1146   :  { %v1731_v11 = vpop.xlane.xlu0 %1730 }
0x1147   :  { %v1735_v14 = vmul.f32 0.03125, %v1731_v11 }
0x1149   :  { %v1737_v15 = vsub.f32 %v1725_v4, %v1735_v14 }
0x114a   :  { %v1734_v16 = vpop.xlane.xlu0 %1733 }
0x114b   :  { %v1736_v12 = vmul.f32 0.03125, %v1734_v16  ;;  %v1739_v18 = vmul.f32 %v1737_v15, %v1737_v15 }
0x114d   :  { %v1738_v21 = vsub.f32 %v1726_v8, %v1736_v12  ;;  %v1741_v22 = vsel %vm190_vm2, %v1739_v18, 0.0 }
0x114e   :  { %1742 = vadd.xlane.f32.xlu0 %v1741_v22 }
0x114f   :  { %v1740_v23 = vmul.f32 %v1738_v21, %v1738_v21 }
0x1151   :  { %v1744_v24 = vsel %vm190_vm2, %v1740_v23, 0.0 }
0x1152   :  { %1745 = vadd.xlane.f32.xlu1 %v1744_v24 }
0x11db   :  { %v1743_v32 = vpop.xlane.xlu0 %1742 }
0x11dc   :  { %v1747_v33 = vmul.f32 0.03125, %v1743_v32 }
0x11de   :  { %v1749_v34 = vadd.f32 1e-12, %v1747_v33 }
0x11df   :  { %v1746_v35 = vpop.xlane.xlu1 %1745 }
0x11e0   :  { %4630 = vrsqrt.f32 %v1749_v34  ;;  %v1748_v36 = vmul.f32 0.03125, %v1746_v35 }
0x11e2   :  { %v1750_v37 = vadd.f32 1e-12, %v1748_v36 }
0x11e4   :  { %4632 = vrsqrt.f32 %v1750_v37 }
0x11ea   :  { %v4631_v38 = vpop.eup %4630 }
0x11eb   :  { %v1753_v40 = vmul.f32 %v4631_v38, %v1737_v15 }
0x11ed   :  { %v1761_v13 = vmul.f32 %v3708_v39, %v1753_v40 }
0x11ee   :  { %v4633_v42 = vpop.eup %4632 }
0x11ef   :  { %v1754_v45 = vmul.f32 %v4633_v42, %v1738_v21  ;;  %v5145_v46 = vadd.f32 %v3709_v41, %v1761_v13 }
0x11f1   :  { %v1762_v47 = vmul.f32 %v3708_v39, %v1754_v45  ;;  %4122 = vmatprep.mubr.msk.f32.mxu1 %vm190_vm2, %v5145_v46 }
0x11f3   :  { %v5149_v48 = vadd.f32 %v3709_v41, %v1762_v47 }
0x11f5   :  { %4123 = vmatmul.mubr.msk.f32.vlgmr.msra.gmra.mrb[18].mxu1 %vm190_vm2, %v5149_v48 }
0x12c8   :  { %v4124_v50 = vpop.f32.mrb[18].mxu1 }
0x12c9   :  { %v5156_v51 = vadd.f32 %v4124_v50, %v3715_v49  ;;  %v1856_v52 = vpop.f32.mrb[19].mxu1 }
0x12ca   :  { %v5158_v53 = vadd.f32 %v3715_v49, %v1856_v52 }
0x12cc   :  { %4129 = vmatprep.mubr.msk.f32.mxu1 %vm334_vm3, %v5158_v53  ;;  %v5164_v54 = vpack.i.bf16 %v5156_v51, %v5158_v53 }
0x12ce   :  { %4552 = vrot.lane.b32.xlu1 %v5164_v54, %s4683_s3  ;;  %4547 = vrot.lane.b32.xlu0 %v5164_v54, %s4682_s7  ;;  %s5480_s7 = smov 64   ;;  %s5481_s3 = smov 72  }
0x12d2   :  { %2065 = vrot.lane.b32.xlu1 %v5158_v53, %s4685_s25  ;;  %2067 = vrot.lane.b32.xlu0 %v5156_v51, %s4685_s25  ;;  %s5482_s25 = smov 104  }
0x12d6   :  { %4557 = vrot.lane.b32.xlu1 %v5164_v54, %s5478_s28  ;;  %2429 = vrot.lane.b32.xlu0 %v5158_v53, %s5479_s29 }
0x12da   :  { %2431 = vrot.lane.b32.xlu1 %v5156_v51, %s5479_s29 }
0x1340   :  { %v4553_v55 = vpop.permute.xlu1 %4552  ;;  %v4548_v56 = vpop.permute.xlu0 %4547 }
0x1341   :  { %v4555_v57 = vunpack.i.h.bf16 %v4553_v55  ;;  %v4554_v58 = vunpack.i.l.bf16 %v4553_v55  ;;  %v4550_v59 = vunpack.i.h.bf16 %v4548_v56  ;;  %v4549_v60 = vunpack.i.l.bf16 %v4548_v56 }
0x1343   :  { %v4387_v61 = vpack.c.bf16 %v4550_v59, %v4549_v60  ;;  %v4397_v43 = vpack.c.bf16 %v4555_v57, %v4554_v58 }
0x1344   :  { %v2066_v62 = vpop.permute.xlu1 %2065  ;;  %v2068_v7 = vpop.permute.xlu0 %2067 }
0x1345   :  { %4389 = vmatprep.subr.msk.bf16.mxu1 %vm4934_vm4, %v4387_v61 }
0x1346   :  { %4392 = vmatpush3.bf16.xpose.msk.msra.mxu1 %vm4934_vm4, %v4387_v61 }
0x1347   :  { %4399 = vmatprep.subr.msk.bf16.mxu1 %vm4934_vm4, %v4397_v43 }
0x1348   :  { %v4558_v63 = vpop.permute.xlu1 %4557  ;;  %v2430_v5 = vpop.permute.xlu0 %2429 }
0x1349   :  { %v4560_v0 = vunpack.i.h.bf16 %v4558_v63  ;;  %v4559_v44 = vunpack.i.l.bf16 %v4558_v63 }
0x134b   :  { %v4407_v1 = vpack.c.bf16 %v4560_v0, %v4559_v44 }
0x134c   :  { %v2432_v2 = vpop.permute.xlu1 %2431 }
0x134d   :  { %4130 = vmatmul.mubr.msk.f32.vlgmr.msra.gmra.mrb[20].mxu1 %vm334_vm3, %v5156_v51 }
0x134e   :  { %4402 = vmatpush3.bf16.xpose.msk.msra.mxu1 %vm4934_vm4, %v4397_v43  ;;  %4143 = vmatprep.mubr.msk.f32.mxu1 %vm334_vm3, %v2066_v62 }
0x134f   :  { %4409 = vmatprep.subr.msk.bf16.mxu1 %vm4934_vm4, %v4407_v1 }
0x1355   :  { %4144 = vmatmul.mubr.msk.f32.vlgmr.msra.gmra.mrb[22].mxu1 %vm334_vm3, %v2068_v7 }
0x1356   :  { %4412 = vmatpush3.bf16.xpose.msk.msra.mxu1 %vm4934_vm4, %v4407_v1  ;;  %4167 = vmatprep.mubr.msk.f32.mxu1 %vm334_vm3, %v2430_v5 }
0x135d   :  { %4168 = vmatmul.mubr.msk.f32.vlgmr.msra.gmra.mrb[24].mxu1 %vm334_vm3, %v2432_v2 }
0x1420   :  { %v4131_v3 = vpop.f32.mrb[20].mxu1 }
0x1421   :  { %v1951_v4 = vadd.f32 %v4131_v3, %v4947_v19  ;;  %v1945_v6 = vpop.f32.mrb[21].mxu1 }
0x1422   :  { %v1946_v8 = vadd.f32 %v1945_v6, %v4952_v20 }
0x1423   :  { %v1957_v9 = vsel %vm418_vm5, %v1951_v4, -inf }
0x1424   :  { %1958 = vmax.xlane.f32.xlu1 %v1957_v9  ;;  %v1954_v11 = vsel %vm418_vm5, %v1946_v8, -inf }
0x1425   :  { %1955 = vmax.xlane.f32.xlu0 %v1954_v11 }
0x1428   :  { %v4145_v14 = vpop.f32.mrb[22].mxu1 }
0x1429   :  { %v2147_v15 = vpop.f32.mrb[23].mxu1  ;;  %v2153_v12 = vadd.f32 %v4145_v14, %v4947_v19 }
0x142a   :  { %v2148_v16 = vadd.f32 %v2147_v15, %v4952_v20 }
0x142b   :  { %v2159_v22 = vsel %vm418_vm5, %v2153_v12, -inf }
0x142c   :  { %v2156_v18 = vsel %vm418_vm5, %v2148_v16, -inf }
0x142d   :  { %2157 = vmax.xlane.f32.xlu0 %v2156_v18 }
0x1430   :  { %v4169_v21 = vpop.f32.mrb[24].mxu1 }
0x1431   :  { %v2511_v23 = vpop.f32.mrb[25].mxu1  ;;  %2160 = vmax.xlane.f32.xlu0 %v2159_v22  ;;  %v2517_v47 = vadd.f32 %v4169_v21, %v4947_v19 }
0x1432   :  { %v2512_v49 = vadd.f32 %v2511_v23, %v4952_v20 }
0x1433   :  { %v2523_v52 = vsel %vm418_vm5, %v2517_v47, -inf }
0x1434   :  { %v2520_v50 = vsel %vm418_vm5, %v2512_v49, -inf }
0x14b1   :  { %v1959_v24 = vpop.xlane.xlu1 %1958 }
0x14b2   :  { %v1961_v25 = vsub.f32 %v1951_v4, %v1959_v24  ;;  %v1956_v26 = vpop.xlane.xlu0 %1955 }
0x14b3   :  { %v1960_v29 = vsub.f32 %v1946_v8, %v1956_v26  ;;  %v3724_v26 = vld [vmem:[%s5477_s30 + $0x20] sm:$0xff] }
0x14b4   :  { %v1964_v30 = vmul.f32 1.442695, %v1961_v25  ;;  %v3731_v25 = vld [vmem:[%s5477_s30 + $0x28] sm:$0xff] }
0x14b5   :  { %v1962_v10 = vmul.f32 1.442695, %v1960_v29 }
0x14b6   :  { %4634 = vpow2.f32 %v1964_v30 }
0x14b7   :  { %4636 = vpow2.f32 %v1962_v10 }
0x14ba   :  { %v2158_v31 = vpop.xlane.xlu0 %2157 }
0x14bb   :  { %v2162_v32 = vsub.f32 %v2148_v16, %v2158_v31 }
0x14bd   :  { %v2164_v33 = vmul.f32 1.442695, %v2162_v32 }
0x14be   :  { %v2161_v34 = vpop.xlane.xlu0 %2160 }
0x14bf   :  { %4638 = vpow2.f32 %v2164_v33  ;;  %v2163_v35 = vsub.f32 %v2153_v12, %v2161_v34 }
0x14c0   :  { %v4635_v36 = vpop.eup %4634 }
0x14c1   :  { %v4637_v37 = vpop.eup %4636  ;;  %v2166_v38 = vmul.f32 1.442695, %v2163_v35  ;;  %v1969_v39 = vsel %vm418_vm5, %v4635_v36, 0.0 }
0x14c2   :  { %1970 = vadd.xlane.f32.xlu0 %v1969_v39  ;;  %v1966_v40 = vsel %vm418_vm5, %v4637_v37, 0.0 }
0x14c3   :  { %4640 = vpow2.f32 %v2166_v38  ;;  %1967 = vadd.xlane.f32.xlu1 %v1966_v40 }
0x14c9   :  { %v4639_v41 = vpop.eup %4638 }
0x14ca   :  { %v2168_v13 = vsel %vm418_vm5, %v4639_v41, 0.0 }
0x14cb   :  { %2169 = vadd.xlane.f32.xlu1 %v2168_v13 }
0x14cd   :  { %v4641_v42 = vpop.eup %4640 }
0x14ce   :  { %v2171_v45 = vsel %vm418_vm5, %v4641_v42, 0.0 }
0x14cf   :  { %2172 = vadd.xlane.f32.xlu0 %v2171_v45 }
0x14dc   :  { %4562 = vrot.lane.b32.xlu1 %v5164_v54, %s5480_s7 }
0x14e0   :  { %4572 = vrot.lane.b32.xlu1 %v5164_v54, %s5481_s3 }
0x14e4   :  { %2714 = vrot.lane.b32.xlu1 %v5158_v53, %s5482_s25 }
0x14e5   :  { %4567 = vrot.lane.b32.xlu0 %v5164_v54, %s5483_s27 }
0x14e9   :  { %2716 = vrot.lane.b32.xlu0 %v5156_v51, %s5482_s25 }
0x1508   :  { %2521 = vmax.xlane.f32.xlu1 %v2520_v50  ;;  %2524 = vmax.xlane.f32.xlu0 %v2523_v52 }
0x154f   :  { %v1971_v56 = vpop.xlane.xlu0 %1970 }
0x1550   :  { %v1968_v55 = vpop.xlane.xlu1 %1967 }
0x1551   :  { %4642 = vrcp.f32 %v1968_v55 }
0x1552   :  { %4644 = vrcp.f32 %v1971_v56  ;;  %v3742_v56 = vld [vmem:[%s5477_s30 + $0x30] sm:$0xff] }
0x1558   :  { %v2170_v53 = vpop.xlane.xlu1 %2169 }
0x1559   :  { %4646 = vrcp.f32 %v2170_v53 }
0x155b   :  { %v4643_v57 = vpop.eup %4642 }
0x155c   :  { %v4563_v58 = vpop.permute.xlu1 %4562  ;;  %v2173_v59 = vpop.xlane.xlu0 %2172  ;;  %v1973_v51 = vmul.f32 %v4643_v57, %v4637_v37 }
0x155d   :  { %v4565_v60 = vunpack.i.h.bf16 %v4563_v58  ;;  %v4564_v19 = vunpack.i.l.bf16 %v4563_v58  ;;  %4648 = vrcp.f32 %v2173_v59  ;;  %v4645_v61 = vpop.eup %4644 }
0x155e   :  { %4136 = vmatprep.mubr.msk.f32.mxu0 %vm418_vm5, %v1973_v51  ;;  %v1975_v5 = vmul.f32 %v4645_v61, %v4635_v36 }
0x155f   :  { %v4393_v20 = vpack.c.bf16 %v4565_v60, %v4564_v19 }
0x1560   :  { %v4573_v62 = vpop.permute.xlu1 %4572  ;;  %v4568_v43 = vpop.permute.xlu0 %4567 }
0x1561   :  { %v4575_v63 = vunpack.i.h.bf16 %v4573_v62  ;;  %v4574_v0 = vunpack.i.l.bf16 %v4573_v62  ;;  %v4570_v44 = vunpack.i.h.bf16 %v4568_v43  ;;  %v4569_v1 = vunpack.i.l.bf16 %v4568_v43  ;;  %4394 = vmatprep.subr.bf16.mxu0 %v4393_v20 }
0x1562   :  { %4396 = vmatpush3.bf16.msra.mxu0 %v4393_v20 }
0x1563   :  { %v4647_v7 = vpop.eup %4646  ;;  %v4417_v2 = vpack.c.bf16 %v4575_v63, %v4574_v0  ;;  %v4403_v3 = vpack.c.bf16 %v4570_v44, %v4569_v1 }
0x1564   :  { %v2715_v4 = vpop.permute.xlu1 %2714  ;;  %v2175_v6 = vmul.f32 %v4647_v7, %v4639_v41  ;;  %v2717_v11 = vpop.permute.xlu0 %2716  ;;  %v4678_v41 = vld [vmem:[%s5476_s0] sm:$0xff] }
0x1565   :  { %4137 = vmatmul.mubr.msk.f32.vlgmr.msra.gmra.mrb[10].mxu0 %vm418_vm5, %v1975_v5  ;;  %4404 = vmatprep.subr.bf16.mxu0 %v4403_v3 }
0x1566   :  { %4419 = vmatprep.subr.msk.bf16.mxu1 %vm4934_vm4, %v4417_v2  ;;  %4186 = vmatprep.mubr.msk.f32.mxu1 %vm334_vm3, %v2715_v4 }
0x1567   :  { %v4649_v8 = vpop.eup %4648  ;;  %4406 = vmatpush3.bf16.msra.mxu0 %v4403_v3  ;;  %4150 = vmatprep.mubr.msk.f32.mxu0 %vm418_vm5, %v2175_v6  ;;  %v3751_v3 = vld [vmem:[%s5477_s30 + $0x38] sm:$0xff] }
0x1568   :  { %v2177_v9 = vmul.f32 %v4649_v8, %v4641_v42  ;;  %4422 = vmatpush3.bf16.xpose.msk.msra.mxu1 %vm4934_vm4, %v4417_v2  ;;  %4153 = vmatprep.subr.mxu0 %v3731_v25  ;;  %v4679_v42 = vld [vmem:[%s5476_s0 + $0x8] sm:$0xff]  ;;  %s5485_s0 = smov 40  }
0x156a   :  { %4151 = vmatmul.mubr.msk.f32.vlgmr.msra.gmra.mrb[12].mxu0 %vm418_vm5, %v2177_v9 }
0x156b   :  { %4154 = vmatpush3.msra.mxu0 %v3731_v25 }
0x156c   :  { %4158 = vmatprep.subr.mxu0 %v3724_v26 }
0x156f   :  { %4187 = vmatmul.mubr.msk.f32.vlgmr.msra.gmra.mrb[26].mxu1 %vm334_vm3, %v2717_v11 }
0x1595   :  { %v2522_v14 = vpop.xlane.xlu1 %2521  ;;  %v2525_v15 = vpop.xlane.xlu0 %2524 }
0x1596   :  { %v2526_v16 = vsub.f32 %v2512_v49, %v2522_v14  ;;  %v2527_v12 = vsub.f32 %v2517_v47, %v2525_v15  ;;  %v3755_v14 = vld [vmem:[%s5425_s9 + $0x1] ss:$0 sm:$0xff] }
0x1598   :  { %v2528_v18 = vmul.f32 1.442695, %v2526_v16  ;;  %v2530_v21 = vmul.f32 1.442695, %v2527_v12 }
0x159a   :  { %4650 = vpow2.f32 %v2528_v18 }
0x159b   :  { %4652 = vpow2.f32 %v2530_v21 }
0x15a4   :  { %v4651_v22 = vpop.eup %4650 }
0x15a5   :  { %v4653_v23 = vpop.eup %4652  ;;  %v2532_v24 = vsel %vm418_vm5, %v4651_v22, 0.0 }
0x15a6   :  { %2533 = vadd.xlane.f32.xlu0 %v2532_v24  ;;  %v2535_v17 = vsel %vm418_vm5, %v4653_v23, 0.0 }
0x15a7   :  { %2536 = vadd.xlane.f32.xlu1 %v2535_v17 }
0x15bc   :  { %4577 = vrot.lane.b32.xlu0 %v5164_v54, %s5484_s8 }
0x1633   :  { %v2534_v29 = vpop.xlane.xlu0 %2533 }
0x1634   :  { %v2537_v32 = vpop.xlane.xlu1 %2536  ;;  %4654 = vrcp.f32 %v2534_v29 }
0x1635   :  { %4656 = vrcp.f32 %v2537_v32 }
0x1637   :  { %v4578_v10 = vpop.permute.xlu0 %4577 }
0x1638   :  { %v4138_v30 = vpop.f32.mrb[10].mxu0  ;;  %v4580_v33 = vunpack.i.h.bf16 %v4578_v10  ;;  %v4579_v34 = vunpack.i.l.bf16 %v4578_v10 }
0x1639   :  { %v2054_v31 = vpop.f32.mrb[11].mxu0 }
0x163a   :  { %v4413_v37 = vpack.c.bf16 %v4580_v33, %v4579_v34  ;;  %v3761_v34 = vld [vmem:[%s5426_s12 + $0x28] sm:$0xff] }
0x163d   :  { %v4152_v35 = vpop.f32.mrb[12].mxu0 }
0x163e   :  { %v2256_v36 = vpop.f32.mrb[13].mxu0  ;;  %v4655_v40 = vpop.eup %4654 }
0x163f   :  { %4155 = vmatprep.mubr.msk.f32.mxu0 %vm334_vm3, %v2256_v36  ;;  %v4657_v49 = vpop.eup %4656  ;;  %v2539_v50 = vmul.f32 %v4655_v40, %v4651_v22  ;;  %v3762_v36 = vld [vmem:[%s5426_s12 + $0x30] sm:$0xff] }
0x1640   :  { %4156 = vmatmul.mubr.msk.f32.vlgmr.msra.gmra.mrb[14].mxu0 %vm334_vm3, %v4152_v35  ;;  %v2541_v52 = vmul.f32 %v4657_v49, %v4653_v23  ;;  %v3758_v49 = vld [vmem:[%s5427_s10 + $0x1] ss:$0 sm:$0xff] }
0x1641   :  { %4159 = vmatpush3.msra.mxu0 %v3724_v26  ;;  %4160 = vmatprep.mubr.msk.f32.mxu0 %vm334_vm3, %v2054_v31 }
0x1642   :  { %v4188_v38 = vpop.f32.mrb[26].mxu1  ;;  %4414 = vmatprep.subr.bf16.mxu0 %v4413_v37 }
0x1643   :  { %v2796_v39 = vpop.f32.mrb[27].mxu1  ;;  %v2802_v45 = vadd.f32 %v4679_v42, %v4188_v38 }
0x1644   :  { %v2797_v13 = vadd.f32 %v4678_v41, %v2796_v39 }
0x1645   :  { %v2808_v55 = vsel %vm418_vm5, %v2802_v45, -inf }
0x1646   :  { %v2805_v47 = vsel %vm418_vm5, %v2797_v13, -inf }
0x1647   :  { %2806 = vmax.xlane.f32.xlu1 %v2805_v47 }
0x1648   :  { %4161 = vmatmul.mubr.msk.f32.vlgmr.msra.gmra.mrb[14].mxu0 %vm334_vm3, %v4138_v30 }
0x1649   :  { %4416 = vmatpush3.bf16.msra.mxu0 %v4413_v37  ;;  %4174 = vmatprep.mubr.msk.f32.mxu0 %vm418_vm5, %v2539_v50  ;;  %v3763_v37 = vld [vmem:[%s5426_s12 + $0x38] sm:$0xff] }
0x164a   :  { %4177 = vmatprep.subr.mxu0 %v3742_v56  ;;  %v4431_v38 = vpack.c.bf16 %v3763_v37, %v3762_v36 }
0x164b   :  { %2809 = vmax.xlane.f32.xlu1 %v2808_v55 }
0x164c   :  { %4175 = vmatmul.mubr.msk.f32.vlgmr.msra.gmra.mrb[16].mxu0 %vm418_vm5, %v2541_v52  ;;  %v3759_v52 = vld [vmem:[%s5428_s11 + $0x1] ss:$0 sm:$0xff] }
0x164d   :  { %4178 = vmatpush3.msra.mxu0 %v3742_v56 }
0x16d4   :  { %v2807_v53 = vpop.xlane.xlu1 %2806 }
0x16d5   :  { %v2811_v57 = vsub.f32 %v2797_v13, %v2807_v53 }
0x16d7   :  { %v2813_v51 = vmul.f32 1.442695, %v2811_v57 }
0x16d8   :  { %v2810_v58 = vpop.xlane.xlu1 %2809 }
0x16d9   :  { %v2812_v59 = vsub.f32 %v2802_v45, %v2810_v58 }
0x16db   :  { %v2815_v60 = vmul.f32 1.442695, %v2812_v59 }
0x16dd   :  { %4658 = vpow2.f32 %v2815_v60  ;;  %v3769_v60 = vld [vmem:[%s5429_s14 + $0x48] sm:$0xff] }
0x16de   :  { %4660 = vpow2.f32 %v2813_v51  ;;  %v3768_v51 = vld [vmem:[%s5429_s14 + $0x40] sm:$0xff] }
0x16e7   :  { %v4659_v19 = vpop.eup %4658 }
0x16e8   :  { %v2820_v20 = vsel %vm418_vm5, %v4659_v19, 0.0  ;;  %v4661_v61 = vpop.eup %4660 }
0x16e9   :  { %2821 = vadd.xlane.f32.xlu1 %v2820_v20  ;;  %v2817_v62 = vsel %vm418_vm5, %v4661_v61, 0.0  ;;  %v3770_v20 = vld [vmem:[%s5429_s14 + $0x50] sm:$0xff] }
0x16ed   :  { %2818 = vadd.xlane.f32.xlu1 %v2817_v62 }
0x16fe   :  { %4582 = vrot.lane.b32.xlu1 %v5164_v54, %s5485_s0 }
0x171f   :  { %v4176_v43 = vpop.f32.mrb[16].mxu0 }
0x1720   :  { %v2620_v63 = vpop.f32.mrb[17].mxu0 }
0x1721   :  { %4179 = vmatprep.mubr.msk.f32.mxu0 %vm334_vm3, %v2620_v63  ;;  %v3773_v63 = vld [vmem:[%s5429_s14 + $0x68] sm:$0xff] }
0x1722   :  { %4180 = vmatmul.mubr.msk.f32.vlgmr.msra.gmra.mrb[14].mxu0 %vm334_vm3, %v4176_v43  ;;  %v3772_v43 = vld [vmem:[%s5429_s14 + $0x60] sm:$0xff] }
0x1776   :  { %v2822_v0 = vpop.xlane.xlu1 %2821 }
0x1777   :  { %4662 = vrcp.f32 %v2822_v0  ;;  %v4443_v0 = vpack.c.bf16 %v3773_v63, %v3772_v43  ;;  %v3783_v63 = vld [vmem:[%s5433_s17 + $0x1] ss:$0 sm:$0xff] }
0x177a   :  { %v2819_v44 = vpop.xlane.xlu1 %2818 }
0x177b   :  { %4664 = vrcp.f32 %v2819_v44  ;;  %v3774_v44 = vld [vmem:[%s5429_s14 + $0x70] sm:$0xff] }
0x177e   :  { %v4583_v1 = vpop.permute.xlu1 %4582 }
0x177f   :  { %v4585_v7 = vunpack.i.h.bf16 %v4583_v1  ;;  %v4584_v5 = vunpack.i.l.bf16 %v4583_v1  ;;  %v3775_v1 = vld [vmem:[%s5429_s14 + $0x78] sm:$0xff] }
0x1781   :  { %v4423_v2 = vpack.c.bf16 %v4585_v7, %v4584_v5  ;;  %v4663_v54 = vpop.eup %4662  ;;  %v4447_v7 = vpack.c.bf16 %v3775_v1, %v3774_v44  ;;  %v3765_v5 = vld [vmem:[%s5430_s13 + $0x1] ss:$0 sm:$0xff] }
0x1782   :  { %v2826_v8 = vmul.f32 %v4663_v54, %v4659_v19  ;;  %v4435_v19 = vpack.c.bf16 %v3769_v60, %v3768_v51 }
0x1783   :  { %4424 = vmatprep.subr.bf16.mxu0 %v4423_v2 }
0x1784   :  { %4426 = vmatpush3.bf16.msra.mxu0 %v4423_v2 }
0x1785   :  { %v4665_v4 = vpop.eup %4664  ;;  %4196 = vmatprep.subr.mxu0 %v3751_v3 }
0x1786   :  { %v2824_v6 = vmul.f32 %v4665_v4, %v4661_v61  ;;  %v3771_v61 = vld [vmem:[%s5429_s14 + $0x58] sm:$0xff] }
0x1787   :  { %v4439_v62 = vpack.c.bf16 %v3771_v61, %v3770_v20  ;;  %v3782_v20 = vld [vmem:[%s5432_s16 + $0x1] ss:$0 sm:$0xff] }
0x1788   :  { %4193 = vmatprep.mubr.msk.f32.mxu0 %vm418_vm5, %v2824_v6 }
0x1789   :  { %4194 = vmatmul.mubr.msk.f32.vlgmr.msra.gmra.mrb[18].mxu0 %vm418_vm5, %v2826_v8 }
0x178a   :  { %4197 = vmatpush3.msra.mxu0 %v3751_v3 }
0x178b   :  { %4436 = vmatprep.subr.bf16.mxu0 %v4435_v19 }
0x185c   :  { %v4195_v9 = vpop.f32.mrb[18].mxu0 }
0x185d   :  { %v2905_v11 = vpop.f32.mrb[19].mxu0 }
0x185e   :  { %4198 = vmatprep.mubr.msk.f32.mxu0 %vm334_vm3, %v2905_v11 }
0x185f   :  { %4199 = vmatmul.mubr.msk.f32.vlgmr.msra.gmra.mrb[14].mxu0 %vm334_vm3, %v4195_v9 }
0x1860   :  { %4438 = vmatpush3.bf16.msra.mxu0 %v4435_v19  ;;  %v3316_v19 = vshrl.u32 %v81_v27, 7  ;;  %v3399_v27 = vld [vmem:[%s5434_s20] sm:$0xff] }
0x1861   :  { %4440 = vmatprep.subr.bf16.mxu0 %v4439_v62 }
0x1864   :  { %4442 = vmatpush3.bf16.msra.mxu0 %v4439_v62 }
0x1865   :  { %4444 = vmatprep.subr.bf16.mxu0 %v4443_v0 }
0x1868   :  { %4446 = vmatpush3.bf16.msra.mxu0 %v4443_v0  ;;  %v3317_v0 = vmul.u32 8, %v3316_v19 }
0x1869   :  { %4448 = vmatprep.subr.bf16.mxu0 %v4447_v7 }
0x186a   :  { %vm3318_vm8 = vcmp.eq.s32.totalorder %v4877_v28, %v3317_v0  ;;  %v3394_v28 = vld [vmem:[%s5435_s19] sm:$0xff] }
0x186c   :  { %4450 = vmatpush3.bf16.msra.mxu0 %v4447_v7 }
0x1932   :  { %v4200_v15 = vpop.f32.mrb[14].mxu0 }
0x1933   :  { %v3008_v16 = vadd.f32 %v4200_v15, %v3755_v14  ;;  %v2988_v12 = vpop.f32.mrb[15].mxu0 }
0x1934   :  { %v3007_v18 = vadd.f32 %v3755_v14, %v2988_v12 }
0x1935   :  { %v3010_v21 = vadd.f32 %v3008_v16, %v5149_v48 }
0x1936   :  { %v3009_v22 = vadd.f32 %v3007_v18, %v5145_v46  ;;  %v3760_v46 = vld [vmem:[%s5426_s12 + $0x20] sm:$0xff] }
0x1937   :  { %v3018_v23 = vsel %vm190_vm2, %v3010_v21, 0.0  ;;  %v4427_v35 = vpack.c.bf16 %v3761_v34, %v3760_v46 }
0x1938   :  { %3019 = vadd.xlane.f32.xlu1 %v3018_v23  ;;  %v3015_v24 = vsel %vm190_vm2, %v3009_v22, 0.0 }
0x1939   :  { %3016 = vadd.xlane.f32.xlu0 %v3015_v24  ;;  %4428 = vmatprep.subr.bf16.mxu1 %v4427_v35 }
0x193a   :  { %4430 = vmatpush3.bf16.msra.mxu1 %v4427_v35 }
0x193b   :  { %4432 = vmatprep.subr.bf16.mxu1 %v4431_v38 }
0x193e   :  { %4434 = vmatpush3.bf16.msra.mxu1 %v4431_v38 }
0x19c5   :  { %v3020_v17 = vpop.xlane.xlu1 %3019 }
0x19c6   :  { %v3022_v25 = vmul.f32 0.03125, %v3020_v17  ;;  %v3017_v26 = vpop.xlane.xlu0 %3016 }
0x19c7   :  { %v3021_v29 = vmul.f32 0.03125, %v3017_v26 }
0x19c8   :  { %v3024_v30 = vsub.f32 %v3010_v21, %v3022_v25 }
0x19c9   :  { %v3023_v10 = vsub.f32 %v3009_v22, %v3021_v29 }
0x19ca   :  { %v3026_v33 = vmul.f32 %v3024_v30, %v3024_v30 }
0x19cb   :  { %v3025_v31 = vmul.f32 %v3023_v10, %v3023_v10 }
0x19cc   :  { %v3030_v48 = vsel %vm190_vm2, %v3026_v33, 0.0 }
0x19cd   :  { %v3027_v32 = vsel %vm190_vm2, %v3025_v31, 0.0 }
0x19ce   :  { %3028 = vadd.xlane.f32.xlu0 %v3027_v32 }
0x19d2   :  { %3031 = vadd.xlane.f32.xlu0 %v3030_v48 }
0x1a5b   :  { %v3029_v39 = vpop.xlane.xlu0 %3028 }
0x1a5c   :  { %v3033_v40 = vmul.f32 0.03125, %v3029_v39 }
0x1a5e   :  { %v3035_v41 = vadd.f32 1e-12, %v3033_v40 }
0x1a5f   :  { %v3032_v13 = vpop.xlane.xlu0 %3031 }
0x1a60   :  { %4666 = vrsqrt.f32 %v3035_v41  ;;  %v3034_v42 = vmul.f32 0.03125, %v3032_v13 }
0x1a62   :  { %v3036_v45 = vadd.f32 1e-12, %v3034_v42 }
0x1a64   :  { %4668 = vrsqrt.f32 %v3036_v45 }
0x1a6a   :  { %v4667_v47 = vpop.eup %4666 }
0x1a6b   :  { %v3039_v50 = vmul.f32 %v4667_v47, %v3023_v10  ;;  %v3777_v10 = vld [vmem:[%s5431_s15 + $0x1] ss:$0 sm:$0xff] }
0x1a6d   :  { %v3047_v55 = vmul.f32 %v3758_v49, %v3039_v50  ;;  %v4693_v50 = vmov 0.0|0.0  }
0x1a6e   :  { %v4669_v56 = vpop.eup %4668  ;;  %4451 = vmatprep.subr.bf16.mxu1 %v4693_v50  ;;  %4464 = vmatprep.subr.bf16.mxu0 %v4693_v50 }
0x1a6f   :  { %v3040_v53 = vmul.f32 %v4669_v56, %v3024_v30  ;;  %v3055_v57 = vadd.f32 %v3759_v52, %v3047_v55 }
0x1a71   :  { %v3048_v58 = vmul.f32 %v3758_v49, %v3040_v53  ;;  %4209 = vmatprep.mubr.msk.f32.mxu1 %vm190_vm2, %v3055_v57 }
0x1a73   :  { %v3056_v59 = vadd.f32 %v3759_v52, %v3048_v58  ;;  %v4695_v52 = vmov 0.0  }
0x1a75   :  { %4210 = vmatmul.mubr.msk.f32.vlgmr.msra.gmra.mrb[28].mxu1 %vm190_vm2, %v3056_v59 }
0x1a76   :  { %4235 = vmatprep.mubr.msk.f32.mxu1 %vm4694_vm7, %v4695_v52 }
0x1b48   :  { %v4211_v2 = vpop.f32.mrb[28].mxu1 }
0x1b49   :  { %v3148_v3 = vadd.f32 %v4211_v2, %v3765_v5  ;;  %v3142_v54 = vpop.f32.mrb[29].mxu1 }
0x1b4a   :  { %v3143_v4 = vadd.f32 %v3765_v5, %v3142_v54  ;;  %v3400_v5 = vld [vmem:[%s5434_s20 + $0x8] sm:$0x1] }
0x1b4b   :  { %v3152_v6 = vmul.f32 %v3148_v3, %v3148_v3  ;;  %v4455_v54 = vpack.c.bf16 %v3400_v5, %v3399_v27 }
0x1b4c   :  { %v3151_v8 = vmul.f32 %v3143_v4, %v3143_v4 }
0x1b4d   :  { %v3154_v9 = vmul.f32 %v3152_v6, %v3148_v3  ;;  %v3398_v6 = vld [vmem:[%s5436_s18] sm:$0x3] }
0x1b4e   :  { %v3153_v11 = vmul.f32 %v3151_v8, %v3143_v4 }
0x1b4f   :  { %v3156_v14 = vmul.f32 0.044715, %v3154_v9  ;;  %v3396_v9 = vld [vmem:[%s5435_s19 + $0x10] sm:$0xff] }
0x1b50   :  { %v3155_v15 = vmul.f32 0.044715, %v3153_v11  ;;  %v3397_v11 = vld [vmem:[%s5435_s19 + $0x18] sm:$0xff] }
0x1b51   :  { %v3158_v16 = vadd.f32 %v3156_v14, %v3148_v3  ;;  %v4462_v14 = vpack.c.bf16 %v3397_v11, %v3396_v9 }
0x1b52   :  { %v3157_v12 = vadd.f32 %v3155_v15, %v3143_v4  ;;  %v3561_v15 = vld [vmem:[%s5437_s22] sm:$0xff] }
0x1b53   :  { %v3160_v18 = vmul.f32 0.7978846, %v3158_v16  ;;  %v3562_v16 = vld [vmem:[%s5437_s22 + $0x8] sm:$0xff] }
0x1b54   :  { %v3159_v21 = vmul.f32 0.7978846, %v3157_v12  ;;  %v4465_v12 = vpack.c.bf16 %v3562_v16, %v3561_v15 }
0x1b55   :  { %4670 = vtanh.f32 %v3160_v18  ;;  %v3563_v18 = vld [vmem:[%s5437_s22 + $0x10] sm:$0xff] }
0x1b56   :  { %4672 = vtanh.f32 %v3159_v21  ;;  %v3564_v21 = vld [vmem:[%s5437_s22 + $0x18] sm:$0xff] }
0x1b5f   :  { %v4671_v22 = vpop.eup %4670 }
0x1b60   :  { %v4673_v23 = vpop.eup %4672  ;;  %v3164_v24 = vadd.f32 1.0, %v4671_v22  ;;  %v4468_v22 = vpack.c.bf16 %v3564_v21, %v3563_v18 }
0x1b61   :  { %v3163_v17 = vadd.f32 1.0, %v4673_v23 }
0x1b62   :  { %v3166_v25 = vmul.f32 0.5, %v3164_v24 }
0x1b63   :  { %v3165_v26 = vmul.f32 0.5, %v3163_v17 }
0x1b64   :  { %v3168_v30 = vmul.f32 %v3166_v25, %v3148_v3  ;;  %v3784_v3 = vsel %vm3318_vm8, 1.0, %v4695_v52 }
0x1b65   :  { %v3167_v29 = vmul.f32 %v3165_v26, %v3143_v4  ;;  %v3395_v4 = vld [vmem:[%s5435_s19 + $0x8] sm:$0xff]  ;;  %v3565_v26 = vld [vmem:[%s5437_s22 + $0x20] sm:$0xff] }
0x1b66   :  { %v4459_v8 = vpack.c.bf16 %v3395_v4, %v3394_v28 }
0x1b67   :  { %4228 = vmatprep.mubr.msk.f32.mxu0 %vm1643_vm6, %v3167_v29  ;;  %v3566_v29 = vld [vmem:[%s5437_s22 + $0x28] sm:$0xff] }
0x1b68   :  { %4229 = vmatmul.mubr.msk.f32.vlgmr.msra.gmra.mrb[20].mxu0 %vm1643_vm6, %v3168_v30  ;;  %v4471_v30 = vpack.c.bf16 %v3566_v29, %v3565_v26 }
0x1b69   :  { %4272 = vmatprep.mubr.msk.f32.mxu0 %vm4694_vm7, %v4695_v52  ;;  %4466 = vmatpush3.bf16.msra.mxu0 %v4465_v12 }
0x1b6a   :  { %4467 = vmatprep.subr.bf16.mxu0 %v4693_v50 }
0x1b6d   :  { %4469 = vmatpush3.bf16.msra.mxu0 %v4468_v22 }
0x1b6e   :  { %4470 = vmatprep.subr.bf16.mxu0 %v4693_v50 }
0x1b71   :  { %4472 = vmatpush3.bf16.msra.mxu0 %v4471_v30 }
0x1b72   :  { %4473 = vmatprep.subr.bf16.mxu0 %v4693_v50 }
0x1c3b   :  { %v4230_v31 = vpop.f32.mrb[20].mxu0 }
0x1c3c   :  { %v3258_v32 = vpop.f32.mrb[21].mxu0  ;;  %v3264_v33 = vadd.f32 %v4230_v31, %v3777_v10  ;;  %v3568_v31 = vld [vmem:[%s5437_s22 + $0x38] sm:$0xff] }
0x1c3d   :  { %v3259_v48 = vadd.f32 %v3777_v10, %v3258_v32  ;;  %v3567_v10 = vld [vmem:[%s5437_s22 + $0x30] sm:$0xff] }
0x1c3e   :  { %v3268_v35 = vadd.f32 %v3264_v33, %v3056_v59  ;;  %v4474_v32 = vpack.c.bf16 %v3568_v31, %v3567_v10  ;;  %v29_v33 = vstv %s5438_s23 }
0x1c3f   :  { %v3267_v46 = vadd.f32 %v3259_v48, %v3055_v57  ;;  %30 = vst [vmem:[#allocation2] sm:$0x1] %v29_v33 }
0x1c40   :  { %v3276_v36 = vsel %vm190_vm2, %v3268_v35, 0.0  ;;  %4475 = vmatpush3.bf16.msra.mxu0 %v4474_v32 }
0x1c41   :  { %v3273_v34 = vsel %vm190_vm2, %v3267_v46, 0.0 }
0x1c42   :  { %3274 = vadd.xlane.f32.xlu0 %v3273_v34 }
0x1c46   :  { %3277 = vadd.xlane.f32.xlu0 %v3276_v36 }
0x1ccf   :  { %v3275_v37 = vpop.xlane.xlu0 %3274 }
0x1cd0   :  { %v3279_v38 = vmul.f32 0.03125, %v3275_v37 }
0x1cd2   :  { %v3281_v39 = vsub.f32 %v3267_v46, %v3279_v38  ;;  %v3789_v46 = vld [vmem:[%s5439_s21] ss:$0 sm:$0xff] }
0x1cd3   :  { %v3278_v40 = vpop.xlane.xlu0 %3277  ;;  %v3790_v38 = vld [vmem:[#allocation2] ss:$0 sm:$0xff] }
0x1cd4   :  { %v3280_v41 = vmul.f32 0.03125, %v3278_v40  ;;  %v3283_v13 = vmul.f32 %v3281_v39, %v3281_v39 }
0x1cd6   :  { %v3282_v42 = vsub.f32 %v3268_v35, %v3280_v41  ;;  %v3285_v45 = vsel %vm190_vm2, %v3283_v13, 0.0 }
0x1cd7   :  { %3286 = vadd.xlane.f32.xlu0 %v3285_v45 }
0x1cd8   :  { %v3284_v47 = vmul.f32 %v3282_v42, %v3282_v42 }
0x1cda   :  { %v3288_v49 = vsel %vm190_vm2, %v3284_v47, 0.0 }
0x1cdb   :  { %3289 = vadd.xlane.f32.xlu1 %v3288_v49 }
0x1d64   :  { %v3287_v55 = vpop.xlane.xlu0 %3286 }
0x1d65   :  { %v3291_v56 = vmul.f32 0.03125, %v3287_v55 }
0x1d67   :  { %v3293_v53 = vadd.f32 1e-12, %v3291_v56 }
0x1d68   :  { %v3290_v57 = vpop.xlane.xlu1 %3289 }
0x1d69   :  { %4674 = vrsqrt.f32 %v3293_v53  ;;  %v3292_v58 = vmul.f32 0.03125, %v3290_v57 }
0x1d6b   :  { %v3294_v59 = vadd.f32 1e-12, %v3292_v58 }
0x1d6d   :  { %4676 = vrsqrt.f32 %v3294_v59 }
0x1d73   :  { %v4675_v51 = vpop.eup %4674 }
0x1d74   :  { %v3297_v60 = vmul.f32 %v4675_v51, %v3281_v39 }
0x1d76   :  { %v3305_v43 = vmul.f32 %v3782_v20, %v3297_v60 }
0x1d77   :  { %v4677_v61 = vpop.eup %4676 }
0x1d78   :  { %v3298_v62 = vmul.f32 %v4677_v61, %v3282_v42  ;;  %v3313_v1 = vadd.f32 %v3783_v63, %v3305_v43 }
0x1d7a   :  { %v3306_v44 = vmul.f32 %v3782_v20, %v3298_v62 }
0x1d7c   :  { %v3314_v7 = vadd.f32 %v3783_v63, %v3306_v44 }
0x1d7e   :  { %v4452_v2 = vpack.c.bf16 %v3314_v7, %v3313_v1 }
0x1d80   :  { %4453 = vmatpush3.bf16.msra.mxu1 %v4452_v2 }
0x1d81   :  { %4454 = vmatprep.subr.bf16.mxu1 %v4693_v50 }
0x1d83   :  { %4236 = vmatmul.mubr.msk.f32.vlgmr.msra.gmra.mrb[30].mxu1 %vm418_vm5, %v3784_v3 }
0x1d84   :  { %4457 = vmatpush3.bf16.msk.msra.mxu1 %vm4456_vm11, %v4455_v54  ;;  %4242 = vmatprep.mubr.msk.f32.mxu1 %vm4694_vm7, %v4695_v52 }
0x1d85   :  { %4458 = vmatprep.subr.bf16.mxu1 %v4693_v50 }
0x1d87   :  { %4243 = vmatmul.mubr.msk.f32.vlgmr.msra.gmra.mrb[32].mxu1 %vm3401_vm12, %v3398_v6 }
0x1d88   :  { %4460 = vmatpush3.bf16.msra.mxu1 %v4459_v8  ;;  %4253 = vmatprep.mubr.msk.f32.mxu1 %vm4694_vm7, %v4695_v52 }
0x1d89   :  { %4461 = vmatprep.subr.bf16.mxu1 %v4693_v50 }
0x1d8c   :  { %4463 = vmatpush3.bf16.msra.mxu1 %v4462_v14 }
0x1e56   :  { %v3390_v23 = vpop.f32.mrb[30].mxu1 }
0x1e57   :  { %v4237_v24 = vpop.f32.mrb[31].mxu1  ;;  %4254 = vmatmul.mubr.msk.f32.vlgmr.msra.gmra.mrb[34].mxu1 %vm190_vm2, %v3390_v23 }
0x1e5a   :  { %v3475_v17 = vpop.f32.mrb[32].mxu1 }
0x1e5b   :  { %v4244_v25 = vpop.f32.mrb[33].mxu1 }
0x1f2a   :  { %v3548_v48 = vpop.f32.mrb[34].mxu1 }
0x1f2b   :  { %v3549_v34 = vadd.f32 %v3548_v48, %v3475_v17  ;;  %v4255_v35 = vpop.f32.mrb[35].mxu1 }
0x1f2d   :  { %v3559_v36 = vadd.f32 %v3789_v46, %v3549_v34 }
0x1f2f   :  { %v3560_v37 = vmax.f32 %v3559_v36, 0.0 }
0x1f31   :  { %4273 = vmatmul.mubr.msk.f32.vlgmr.msra.gmra.mrb[22].mxu0 %vm1643_vm6, %v3560_v37 }
0x2004   :  { %v3645_v39 = vpop.f32.mrb[22].mxu0 }
0x2005   :  { %v3646_v40 = vadd.f32 %v3790_v38, %v3645_v39  ;;  %v4274_v41 = vpop.f32.mrb[23].mxu0 }
0x2007   :  { %3650 = vst.msk [vmem:[%s5440_s24] sm:$0x3] %vm3649_vm13, %v3646_v40 }

</bundles_post_ra>
